<compile_context>
chip_gen: v5e
topology: v5e:2x2
jax: 0.10.0
libtpu: 0.0.40
codegen_flags: <defaults>
</compile_context>

<pallas_src>
import jax
import jax.numpy as jnp
from jax import lax
from jax.experimental import pallas as pl
from jax.experimental.pallas import tpu as pltpu

HIDDEN = 128
IN_DIM = 57          # useHs=False -> Linear(57, 128)
IN_DIM_PAD = 64      # zero-padded K for clean lane layout
EDGE_DIM = 16


# ----------------------------------------------------------------------------
# Fused forward kernel: grid=(2,) over the (A, B) branches.
# ----------------------------------------------------------------------------
def _fused_forward_kernel(
    # shared inputs
    x_ref, emb_w_ref, emb_b_ref, batch_ref, eattr_ref,
    # per-branch inputs (leading branch dim squeezed away by the BlockSpec)
    src_ref, dst_ref, unit_ref, flag_ref,
    l1_w1_ref, l1_b1_ref, l1_w2_ref, l1_b2_ref, l1_we_ref,
    l2_w1_ref, l2_b1_ref, l2_w2_ref, l2_b2_ref, l2_we_ref,
    wt_ref,
    # output
    out_ref,
    # scratch
    nodefeat_ref, msg_ref,
):
    f32 = jnp.float32
    bf16 = jnp.bfloat16
    N = x_ref.shape[0]
    F = emb_w_ref.shape[1]
    E = eattr_ref.shape[0]
    B = out_ref.shape[0]

    # ---- scalar embed: s = SiLU(x @ We + be); vector starts at zero --------
    s = jnp.dot(x_ref[...], emb_w_ref[...], preferred_element_type=f32)
    s = s + emb_b_ref[...]
    s = s * jax.nn.sigmoid(s)                                    # SiLU (f32)

    # ---- edge one-hots (0/1 exact in bf16), built once per branch ----------
    gather = (lax.broadcasted_iota(jnp.int32, (E, N), 1)
              == src_ref[...]).astype(bf16)                      # [E, N]
    scatter = (lax.broadcasted_iota(jnp.int32, (N, E), 0)
               == dst_ref[...]).astype(bf16)                     # [N, E]

    unit_bc = unit_ref[...]                                      # [E, 3F]
    flag = flag_ref[...]                                         # [1, 1]

    def edge_gate(we_ref):
        # K=16 -> 1 contraction: VPU reduce, not an MXU matmul.
        ew = jax.nn.sigmoid(jnp.sum(eattr_ref[...] * we_ref[...],
                                    axis=-1, keepdims=True))     # [E, 1]
        # A branch (flag == 0) -> gate == 1 exactly; B branch -> sigmoid gate.
        return 1.0 + flag * (ew - 1.0)

    def mp_layer(s, v, w1_ref, b1_ref, w2_ref, b2_ref, we_ref):
        # node MLP: gates = silu(s @ w1 + b1) @ w2 + b2   (bf16 MXU, f32 acc)
        phi = jnp.dot(s.astype(bf16), w1_ref[...],
                      preferred_element_type=f32) + b1_ref[...]
        phi = phi * jax.nn.sigmoid(phi)
        gates = jnp.dot(phi.astype(bf16), w2_ref[...],
                        preferred_element_type=f32) + b2_ref[...]   # [N, 3F]

        # single merged per-edge gather of (gates, vector) on the MXU.
        if v is None:
            # layer 1: vector is identically zero -> narrow gather only.
            gathered = jnp.dot(gather, gates.astype(bf16),
                               preferred_element_type=f32)          # [E, 3F]
            gates_src, vec_src = gathered, None
        else:
            nodefeat_ref[:, :3 * F] = gates.astype(bf16)
            nodefeat_ref[:, 3 * F:] = v.astype(bf16)
            gathered = jnp.dot(gather, nodefeat_ref[...],
                               preferred_element_type=f32)          # [E, 6F]
            gates_src = gathered[:, :3 * F]
            vec_src = gathered[:, 3 * F:]

        # fold the edge gate into the gathered gates with ONE multiply.
        gates_src = gates_src * edge_gate(we_ref)
        gs = gates_src[:, :F]
        gv1 = gates_src[:, F:2 * F]
        gv2 = gates_src[:, 2 * F:]

        # messages written straight into VMEM scratch at 128-lane offsets
        # (no [E,4F] concatenate copy).
        msg_ref[:, :F] = gs.astype(bf16)
        for d in range(3):
            m = unit_bc[:, d * F:(d + 1) * F] * gv2
            if vec_src is not None:
                m = m + vec_src[:, d * F:(d + 1) * F] * gv1
            msg_ref[:, (d + 1) * F:(d + 2) * F] = m.astype(bf16)

        # fused scatter-add over destination nodes: one [N,E]@[E,4F] matmul.
        agg = jnp.dot(scatter, msg_ref[...], preferred_element_type=f32)
        s_out = s + agg[:, :F]
        v_out = agg[:, F:] if v is None else v + agg[:, F:]
        return s_out, v_out

    s, v = mp_layer(s, None,
                    l1_w1_ref, l1_b1_ref, l1_w2_ref, l1_b2_ref, l1_we_ref)
    s, v = mp_layer(s, v,
                    l2_w1_ref, l2_b1_ref, l2_w2_ref, l2_b2_ref, l2_we_ref)

    # ---- tail: global_add_pool FIRST (lane-dense MXU op), then the folded
    #            sc_fc_1 @ sc_fc_2 @ fc_1 projection as a tiny VPU reduce. ---
    pool = (lax.broadcasted_iota(jnp.int32, (B, N), 0)
            == batch_ref[...]).astype(bf16)                       # [B, N]
    pooled = jnp.dot(pool, v.astype(bf16),
                     preferred_element_type=f32)                  # [B, 3F]
    weighted = pooled * wt_ref[...]                               # [B, 3F]
    cols = [jnp.sum(weighted[:, d * F:(d + 1) * F], axis=-1, keepdims=True)
            for d in range(3)]
    out_ref[...] = jnp.concatenate(cols, axis=-1)                 # [B, 3]


# ----------------------------------------------------------------------------
# Parameters (deterministic, torch.nn.Linear-style uniform init) + packing.
# ----------------------------------------------------------------------------
def init_params(key, in_dim=IN_DIM, hidden=HIDDEN, edge_dim=EDGE_DIM):
    keys = iter(jax.random.split(key, 32))

    def lin_w(i, o):
        s = 1.0 / (i ** 0.5)
        return jax.random.uniform(next(keys), (i, o), jnp.float32, -s, s)

    def lin_b(i, o):
        s = 1.0 / (i ** 0.5)
        return jax.random.uniform(next(keys), (o,), jnp.float32, -s, s)

    def layer_params(use_edge):
        return {
            "w1": lin_w(hidden, hidden),
            "b1": lin_b(hidden, hidden),
            "w2": lin_w(hidden, 3 * hidden),
            "b2": lin_b(hidden, 3 * hidden),
            "we": (lin_w(edge_dim, 1) if use_edge
                   else jnp.zeros((edge_dim, 1), jnp.float32)),
        }

    return {
        "embed_w": lin_w(in_dim, hidden),
        "embed_b": lin_b(in_dim, hidden),
        "gcn_1_A": layer_params(False),
        "gcn_1_B": layer_params(True),
        "gcn_2_A": layer_params(False),
        "gcn_2_B": layer_params(True),
        "sc_fc_1_w": lin_w(2 * hidden, hidden),   # Linear(256,128,bias=False)
        "sc_fc_2_w": lin_w(hidden, hidden),       # Linear(128,128,bias=False)
        "fc_1_w": lin_w(hidden, 1),               # Linear(128,  1,bias=False)
    }


def pack_params(p, hidden=HIDDEN, in_dim=IN_DIM, in_dim_pad=IN_DIM_PAD):
    """One-time packing: A/B stacking, bf16 casts, bias reshapes, tail fold.
    Hoisted out of the per-call path (no per-launch cast/reshape XLA ops)."""
    F = hidden

    def stack_layer(pA, pB):
        return {
            "w1": jnp.stack([pA["w1"], pB["w1"]]).astype(jnp.bfloat16),
            "b1": jnp.stack([pA["b1"].reshape(1, F),
                             pB["b1"].reshape(1, F)]).astype(jnp.float32),
            "w2": jnp.stack([pA["w2"], pB["w2"]]).astype(jnp.bfloat16),
            "b2": jnp.stack([pA["b2"].reshape(1, 3 * F),
                             pB["b2"].reshape(1, 3 * F)]).astype(jnp.float32),
            "we": jnp.stack([pA["we"].reshape(1, -1),
                             pB["we"].reshape(1, -1)]).astype(jnp.float32),
        }

    # embed: zero-pad K 57 -> 64 so padded input lanes contribute nothing.
    emb_w = jnp.pad(p["embed_w"], ((0, in_dim_pad - in_dim), (0, 0)))

    # activation-free tail: fold sc_fc_1 @ sc_fc_2 @ fc_1 -> [256, 1], split
    # per branch and repeat over the 3 spatial components so the in-kernel
    # projection is a plain lane-wise multiply + per-block reduce.
    w_tail = p["sc_fc_1_w"] @ p["sc_fc_2_w"] @ p["fc_1_w"]        # [2F, 1]
    wA = jnp.tile(w_tail[:F, 0], 3).reshape(1, 3 * F)
    wB = jnp.tile(w_tail[F:, 0], 3).reshape(1, 3 * F)

    return {
        "emb_w": emb_w.astype(jnp.bfloat16),
        "emb_b": p["embed_b"].reshape(1, F).astype(jnp.float32),
        "l1": stack_layer(p["gcn_1_A"], p["gcn_1_B"]),
        "l2": stack_layer(p["gcn_2_A"], p["gcn_2_B"]),
        "w_tail": jnp.stack([wA, wB]).astype(jnp.float32),        # [2, 1, 3F]
        "flag": jnp.array([0.0, 1.0], jnp.float32).reshape(2, 1, 1),
    }


# ----------------------------------------------------------------------------
# Full forward pass (one pallas_call).
# ----------------------------------------------------------------------------
def molnet_eq_dipole_forward(packed, scalar, pos, edge_index_A, edge_index_B,
                             edge_attr, batch, num_graphs):
    N, in_dim = scalar.shape
    F = HIDDEN
    E = edge_index_A.shape[1]
    assert edge_index_B.shape[1] == E

    # bf16 node features (they become bf16 MXU operands in-kernel anyway).
    x = jnp.pad(scalar, ((0, 0), (0, IN_DIM_PAD - in_dim))).astype(jnp.bfloat16)

    def edge_prep(edge_index):
        # data-dependent pos gather stays as (tiny) XLA glue.
        src = edge_index[0].astype(jnp.int32)
        dst = edge_index[1].astype(jnp.int32)
        rel = pos[dst] - pos[src]
        unit = rel / (jnp.linalg.norm(rel, axis=-1, keepdims=True) + 1e-8)
        # precompute the lane broadcast once per branch ([E,3] -> [E,3F]);
        # reused by both layers inside the kernel.
        unit_bc = jnp.repeat(unit.astype(jnp.float32), F, axis=1)
        return src.reshape(E, 1), dst.reshape(1, E), unit_bc

    srcA, dstA, unitA = edge_prep(edge_index_A)
    srcB, dstB, unitB = edge_prep(edge_index_B)
    src = jnp.stack([srcA, srcB])                 # [2, E, 1] int32
    dst = jnp.stack([dstA, dstB])                 # [2, 1, E] int32
    unit = jnp.stack([unitA, unitB])              # [2, E, 3F] f32
    batch_row = batch.reshape(1, N).astype(jnp.int32)
    eattr = edge_attr.astype(jnp.float32)

    l1, l2 = packed["l1"], packed["l2"]
    inputs = (x, packed["emb_w"], packed["emb_b"], batch_row, eattr,
              src, dst, unit, packed["flag"],
              l1["w1"], l1["b1"], l1["w2"], l1["b2"], l1["we"],
              l2["w1"], l2["b1"], l2["w2"], l2["b2"], l2["we"],
              packed["w_tail"])

    def shared(shape):
        return pl.BlockSpec(shape, lambda g: (0, 0))

    def branch(shape):
        return pl.BlockSpec((None,) + shape, lambda g: (g, 0, 0))

    in_specs = [
        shared((N, IN_DIM_PAD)),                  # x
        shared((IN_DIM_PAD, F)),                  # embed w
        shared((1, F)),                           # embed b
        shared((1, N)),                           # batch ids
        shared((E, EDGE_DIM)),                    # edge_attr
        branch((E, 1)),                           # src indices
        branch((1, E)),                           # dst indices
        branch((E, 3 * F)),                       # unit lane-broadcast
        branch((1, 1)),                           # use-edge flag
        branch((F, F)), branch((1, F)),           # layer-1 params
        branch((F, 3 * F)), branch((1, 3 * F)),
        branch((1, EDGE_DIM)),
        branch((F, F)), branch((1, F)),           # layer-2 params
        branch((F, 3 * F)), branch((1, 3 * F)),
        branch((1, EDGE_DIM)),
        branch((1, 3 * F)),                       # folded tail weight
    ]

    # advisory cost hint for XLA's scheduler
    flops_branch = 2 * (
        N * IN_DIM_PAD * F                        # embed
        + 2 * (N * F * F + N * F * 3 * F)         # node MLPs (2 layers)
        + E * N * 3 * F + E * N * 6 * F           # gathers (layer 1 / 2)
        + 2 * (N * E * 4 * F)                     # scatters
        + num_graphs * N * 3 * F)                 # pool
    bytes_accessed = sum(a.size * a.dtype.itemsize for a in inputs) \
        + 2 * num_graphs * 3 * 4
    cost = pl.CostEstimate(
        flops=int(2 * flops_branch),
        transcendentals=int(2 * (N * F + 2 * (N * F + E))),
        bytes_accessed=int(bytes_accessed))

    out = pl.pallas_call(
        _fused_forward_kernel,
        out_shape=jax.ShapeDtypeStruct((2, num_graphs, 3), jnp.float32),
        grid=(2,),
        in_specs=in_specs,
        out_specs=pl.BlockSpec((None, num_graphs, 3), lambda g: (g, 0, 0)),
        scratch_shapes=[pltpu.VMEM((N, 6 * F), jnp.bfloat16),   # gather staging
                        pltpu.VMEM((E, 4 * F), jnp.bfloat16)],  # message staging
        compiler_params=pltpu.CompilerParams(
            # A / B branches shard across the two TensorCores on v7x.
            dimension_semantics=("parallel",),
            # explicit budget; actual footprint ~1 MiB << v7x 64 MiB physical.
            vmem_limit_bytes=32 * 1024 * 1024),
        cost_estimate=cost,
    )(*inputs)

    # pooling and the bias-free projections are linear, so the two branch
    # contributions simply add -> final dipole feature [B, 3, 1].
    return jnp.sum(out, axis=0).reshape(num_graphs, 3, 1)


# ----------------------------------------------------------------------------
if __name__ == "__main__":
    key = jax.random.PRNGKey(0)
    N = 16           # nodes: 2 graphs x 8 nodes
    E = 32           # edges (same count for edge_index_A_ and edge_index_B)
    B = 2            # graphs

    kp, kx, kpos, keA, keB, kea = jax.random.split(key, 6)
    params = init_params(kp)
    packed = pack_params(params)

    scalar = jax.random.normal(kx, (N, IN_DIM), jnp.float32)
    pos = jax.random.normal(kpos, (N, 3), jnp.float32)
    batch = jnp.concatenate(
        [jnp.zeros((8,), jnp.int32), jnp.ones((8,), jnp.int32)])

    def make_edges(k):
        k1, k2 = jax.random.split(k)
        e0 = jax.random.randint(k1, (2, E // 2), 0, 8)    # graph-0 edges
        e1 = jax.random.randint(k2, (2, E // 2), 8, 16)   # graph-1 edges
        return jnp.concatenate([e0, e1], axis=1).astype(jnp.int32)

    edge_index_A = make_edges(keA)
    edge_index_B = make_edges(keB)
    edge_attr = jax.random.normal(kea, (E, EDGE_DIM), jnp.float32)

    fwd = jax.jit(molnet_eq_dipole_forward, static_argnums=(7,))
    out = fwd(packed, scalar, pos, edge_index_A, edge_index_B, edge_attr,
              batch, B)
    jax.block_until_ready(out)
    assert out.shape == (B, 3, 1) and out.dtype == jnp.float32
    assert bool(jnp.all(jnp.isfinite(out)))
    print("KERNEL_OK")
</pallas_src>

<mosaic_0001>
module attributes {stable_mosaic.version = 11 : i64} {
  func.func @_fused_forward_kernel(%arg0: i32, %arg1: memref<16x64xbf16, #tpu.memory_space<vmem>>, %arg2: memref<64x128xbf16, #tpu.memory_space<vmem>>, %arg3: memref<1x128xf32, #tpu.memory_space<vmem>>, %arg4: memref<1x16xi32, #tpu.memory_space<vmem>>, %arg5: memref<32x16xf32, #tpu.memory_space<vmem>>, %arg6: memref<1x32x1xi32, #tpu.memory_space<vmem>>, %arg7: memref<1x1x32xi32, #tpu.memory_space<vmem>>, %arg8: memref<1x32x384xf32, #tpu.memory_space<vmem>>, %arg9: memref<1x1x1xf32, #tpu.memory_space<vmem>>, %arg10: memref<1x128x128xbf16, #tpu.memory_space<vmem>>, %arg11: memref<1x1x128xf32, #tpu.memory_space<vmem>>, %arg12: memref<1x128x384xbf16, #tpu.memory_space<vmem>>, %arg13: memref<1x1x384xf32, #tpu.memory_space<vmem>>, %arg14: memref<1x1x16xf32, #tpu.memory_space<vmem>>, %arg15: memref<1x128x128xbf16, #tpu.memory_space<vmem>>, %arg16: memref<1x1x128xf32, #tpu.memory_space<vmem>>, %arg17: memref<1x128x384xbf16, #tpu.memory_space<vmem>>, %arg18: memref<1x1x384xf32, #tpu.memory_space<vmem>>, %arg19: memref<1x1x16xf32, #tpu.memory_space<vmem>>, %arg20: memref<1x1x384xf32, #tpu.memory_space<vmem>>, %arg21: memref<1x2x3xf32, #tpu.memory_space<vmem>>, %arg22: memref<16x768xbf16, #tpu.memory_space<vmem>>, %arg23: memref<32x512xbf16, #tpu.memory_space<vmem>>) attributes {dimension_semantics = [#tpu.dimension_semantics<parallel>], iteration_bounds = array<i64: 2>, scalar_prefetch = 0 : i64, scratch_operands = 2 : i64, tpu.core_type = #tpu.core_type<tc>, window_params = [{pipeline_mode = #tpu.pipeline_mode<synchronous>, transform_indices = @transform_0, window_bounds = array<i64: 16, 64>}, {pipeline_mode = #tpu.pipeline_mode<synchronous>, transform_indices = @transform_1, window_bounds = array<i64: 64, 128>}, {pipeline_mode = #tpu.pipeline_mode<synchronous>, transform_indices = @transform_2, window_bounds = array<i64: 1, 128>}, {pipeline_mode = #tpu.pipeline_mode<synchronous>, transform_indices = @transform_3, window_bounds = array<i64: 1, 16>}, {pipeline_mode = #tpu.pipeline_mode<synchronous>, transform_indices = @transform_4, window_bounds = array<i64: 32, 16>}, {transform_indices = @transform_5, window_bounds = array<i64: 1, 32, 1>}, {transform_indices = @transform_6, window_bounds = array<i64: 1, 1, 32>}, {transform_indices = @transform_7, window_bounds = array<i64: 1, 32, 384>}, {transform_indices = @transform_8, window_bounds = array<i64: 1, 1, 1>}, {transform_indices = @transform_9, window_bounds = array<i64: 1, 128, 128>}, {transform_indices = @transform_10, window_bounds = array<i64: 1, 1, 128>}, {transform_indices = @transform_11, window_bounds = array<i64: 1, 128, 384>}, {transform_indices = @transform_12, window_bounds = array<i64: 1, 1, 384>}, {transform_indices = @transform_13, window_bounds = array<i64: 1, 1, 16>}, {transform_indices = @transform_14, window_bounds = array<i64: 1, 128, 128>}, {transform_indices = @transform_15, window_bounds = array<i64: 1, 1, 128>}, {transform_indices = @transform_16, window_bounds = array<i64: 1, 128, 384>}, {transform_indices = @transform_17, window_bounds = array<i64: 1, 1, 384>}, {transform_indices = @transform_18, window_bounds = array<i64: 1, 1, 16>}, {transform_indices = @transform_19, window_bounds = array<i64: 1, 1, 384>}, {transform_indices = @transform_20, window_bounds = array<i64: 1, 2, 3>}]} {
    %c0 = arith.constant 0 : index
    %c0_0 = arith.constant 0 : index
    %0 = vector.load %arg1[%c0, %c0_0] : memref<16x64xbf16, #tpu.memory_space<vmem>>, vector<16x64xbf16>
    %c0_1 = arith.constant 0 : index
    %c0_2 = arith.constant 0 : index
    %1 = vector.load %arg2[%c0_1, %c0_2] : memref<64x128xbf16, #tpu.memory_space<vmem>>, vector<64x128xbf16>
    %cst = arith.constant dense<0.000000e+00> : vector<16x128xf32>
    %2 = tpu.matmul %0, %1, %cst {dimension_numbers = #tpu.dot_dimension_numbers<[1], [0], [0], [1], [0, 0, 1, 1], [], []>} : vector<16x64xbf16>, vector<64x128xbf16>, vector<16x128xf32> -> vector<16x128xf32>
    %c0_3 = arith.constant 0 : index
    %c0_4 = arith.constant 0 : index
    %3 = vector.load %arg3[%c0_3, %c0_4] : memref<1x128xf32, #tpu.memory_space<vmem>>, vector<1x128xf32>
    %4 = vector.broadcast %3 : vector<1x128xf32> to vector<16x128xf32>
    %5 = arith.addf %2, %4 : vector<16x128xf32>
    %6 = arith.negf %5 : vector<16x128xf32>
    %7 = math.exp %6 : vector<16x128xf32>
    %cst_5 = arith.constant 1.000000e+00 : f32
    %8 = vector.broadcast %cst_5 : f32 to vector<16x128xf32>
    %9 = arith.addf %8, %7 : vector<16x128xf32>
    %10 = arith.divf %8, %9 : vector<16x128xf32>
    %11 = arith.mulf %5, %10 : vector<16x128xf32>
    %12 = tpu.iota {dimensions = array<i32: 1>} : vector<32x16xi32>
    %c0_6 = arith.constant 0 : index
    %c0_7 = arith.constant 0 : index
    %c0_8 = arith.constant 0 : index
    %13 = vector.load %arg6[%c0_6, %c0_7, %c0_8] : memref<1x32x1xi32, #tpu.memory_space<vmem>>, vector<1x32x1xi32>
    %14 = vector.shape_cast %13 : vector<1x32x1xi32> to vector<32x1xi32>
    %15 = vector.broadcast %14 : vector<32x1xi32> to vector<32x16xi32>
    %16 = arith.cmpi eq, %12, %15 : vector<32x16xi32>
    %17 = arith.extui %16 : vector<32x16xi1> to vector<32x16xi32>
    %18 = arith.sitofp %17 : vector<32x16xi32> to vector<32x16xf32>
    %19 = arith.truncf %18 : vector<32x16xf32> to vector<32x16xbf16>
    %20 = tpu.iota {dimensions = array<i32: 0>} : vector<16x32xi32>
    %c0_9 = arith.constant 0 : index
    %c0_10 = arith.constant 0 : index
    %c0_11 = arith.constant 0 : index
    %21 = vector.load %arg7[%c0_9, %c0_10, %c0_11] : memref<1x1x32xi32, #tpu.memory_space<vmem>>, vector<1x1x32xi32>
    %22 = vector.shape_cast %21 : vector<1x1x32xi32> to vector<1x32xi32>
    %23 = vector.broadcast %22 : vector<1x32xi32> to vector<16x32xi32>
    %24 = arith.cmpi eq, %20, %23 : vector<16x32xi32>
    %25 = arith.extui %24 : vector<16x32xi1> to vector<16x32xi32>
    %26 = arith.sitofp %25 : vector<16x32xi32> to vector<16x32xf32>
    %27 = arith.truncf %26 : vector<16x32xf32> to vector<16x32xbf16>
    %c0_12 = arith.constant 0 : index
    %c0_13 = arith.constant 0 : index
    %c0_14 = arith.constant 0 : index
    %28 = vector.load %arg8[%c0_12, %c0_13, %c0_14] : memref<1x32x384xf32, #tpu.memory_space<vmem>>, vector<1x32x384xf32>
    %29 = vector.shape_cast %28 : vector<1x32x384xf32> to vector<32x384xf32>
    %c0_15 = arith.constant 0 : index
    %c0_16 = arith.constant 0 : index
    %c0_17 = arith.constant 0 : index
    %30 = vector.load %arg9[%c0_15, %c0_16, %c0_17] : memref<1x1x1xf32, #tpu.memory_space<vmem>>, vector<1x1x1xf32>
    %31 = vector.shape_cast %30 : vector<1x1x1xf32> to vector<1x1xf32>
    %32 = arith.truncf %11 : vector<16x128xf32> to vector<16x128xbf16>
    %c0_18 = arith.constant 0 : index
    %c0_19 = arith.constant 0 : index
    %c0_20 = arith.constant 0 : index
    %33 = vector.load %arg10[%c0_18, %c0_19, %c0_20] : memref<1x128x128xbf16, #tpu.memory_space<vmem>>, vector<1x128x128xbf16>
    %34 = vector.shape_cast %33 : vector<1x128x128xbf16> to vector<128x128xbf16>
    %cst_21 = arith.constant dense<0.000000e+00> : vector<16x128xf32>
    %35 = tpu.matmul %32, %34, %cst_21 {dimension_numbers = #tpu.dot_dimension_numbers<[1], [0], [0], [1], [0, 0, 1, 1], [], []>} : vector<16x128xbf16>, vector<128x128xbf16>, vector<16x128xf32> -> vector<16x128xf32>
    %c0_22 = arith.constant 0 : index
    %c0_23 = arith.constant 0 : index
    %c0_24 = arith.constant 0 : index
    %36 = vector.load %arg11[%c0_22, %c0_23, %c0_24] : memref<1x1x128xf32, #tpu.memory_space<vmem>>, vector<1x1x128xf32>
    %37 = vector.shape_cast %36 : vector<1x1x128xf32> to vector<1x128xf32>
    %38 = vector.broadcast %37 : vector<1x128xf32> to vector<16x128xf32>
    %39 = arith.addf %35, %38 : vector<16x128xf32>
    %40 = arith.negf %39 : vector<16x128xf32>
    %41 = math.exp %40 : vector<16x128xf32>
    %cst_25 = arith.constant 1.000000e+00 : f32
    %42 = vector.broadcast %cst_25 : f32 to vector<16x128xf32>
    %43 = arith.addf %42, %41 : vector<16x128xf32>
    %44 = arith.divf %42, %43 : vector<16x128xf32>
    %45 = arith.mulf %39, %44 : vector<16x128xf32>
    %46 = arith.truncf %45 : vector<16x128xf32> to vector<16x128xbf16>
    %c0_26 = arith.constant 0 : index
    %c0_27 = arith.constant 0 : index
    %c0_28 = arith.constant 0 : index
    %47 = vector.load %arg12[%c0_26, %c0_27, %c0_28] : memref<1x128x384xbf16, #tpu.memory_space<vmem>>, vector<1x128x384xbf16>
    %48 = vector.shape_cast %47 : vector<1x128x384xbf16> to vector<128x384xbf16>
    %cst_29 = arith.constant dense<0.000000e+00> : vector<16x384xf32>
    %49 = tpu.matmul %46, %48, %cst_29 {dimension_numbers = #tpu.dot_dimension_numbers<[1], [0], [0], [1], [0, 0, 1, 1], [], []>} : vector<16x128xbf16>, vector<128x384xbf16>, vector<16x384xf32> -> vector<16x384xf32>
    %c0_30 = arith.constant 0 : index
    %c0_31 = arith.constant 0 : index
    %c0_32 = arith.constant 0 : index
    %50 = vector.load %arg13[%c0_30, %c0_31, %c0_32] : memref<1x1x384xf32, #tpu.memory_space<vmem>>, vector<1x1x384xf32>
    %51 = vector.shape_cast %50 : vector<1x1x384xf32> to vector<1x384xf32>
    %52 = vector.broadcast %51 : vector<1x384xf32> to vector<16x384xf32>
    %53 = arith.addf %49, %52 : vector<16x384xf32>
    %54 = arith.truncf %53 : vector<16x384xf32> to vector<16x384xbf16>
    %cst_33 = arith.constant dense<0.000000e+00> : vector<32x384xf32>
    %55 = tpu.matmul %19, %54, %cst_33 {dimension_numbers = #tpu.dot_dimension_numbers<[1], [0], [0], [1], [0, 0, 1, 1], [], []>} : vector<32x16xbf16>, vector<16x384xbf16>, vector<32x384xf32> -> vector<32x384xf32>
    %c0_34 = arith.constant 0 : index
    %c0_35 = arith.constant 0 : index
    %56 = vector.load %arg5[%c0_34, %c0_35] : memref<32x16xf32, #tpu.memory_space<vmem>>, vector<32x16xf32>
    %c0_36 = arith.constant 0 : index
    %c0_37 = arith.constant 0 : index
    %c0_38 = arith.constant 0 : index
    %57 = vector.load %arg14[%c0_36, %c0_37, %c0_38] : memref<1x1x16xf32, #tpu.memory_space<vmem>>, vector<1x1x16xf32>
    %58 = vector.shape_cast %57 : vector<1x1x16xf32> to vector<1x16xf32>
    %59 = vector.broadcast %58 : vector<1x16xf32> to vector<32x16xf32>
    %60 = arith.mulf %56, %59 : vector<32x16xf32>
    %cst_39 = arith.constant dense<0.000000e+00> : vector<32xf32>
    %61 = vector.multi_reduction <add>, %60, %cst_39 [1] : vector<32x16xf32> to vector<32xf32>
    %62 = vector.shape_cast %61 : vector<32xf32> to vector<32x1xf32>
    %63 = arith.negf %62 : vector<32x1xf32>
    %64 = math.exp %63 : vector<32x1xf32>
    %cst_40 = arith.constant 1.000000e+00 : f32
    %65 = vector.broadcast %cst_40 : f32 to vector<32x1xf32>
    %66 = arith.addf %65, %64 : vector<32x1xf32>
    %67 = arith.divf %65, %66 : vector<32x1xf32>
    %cst_41 = arith.constant 1.000000e+00 : f32
    %68 = vector.broadcast %cst_41 : f32 to vector<32x1xf32>
    %69 = arith.subf %67, %68 : vector<32x1xf32>
    %70 = vector.broadcast %31 : vector<1x1xf32> to vector<32x1xf32>
    %71 = arith.mulf %70, %69 : vector<32x1xf32>
    %cst_42 = arith.constant 1.000000e+00 : f32
    %72 = vector.broadcast %cst_42 : f32 to vector<32x1xf32>
    %73 = arith.addf %72, %71 : vector<32x1xf32>
    %74 = vector.broadcast %73 : vector<32x1xf32> to vector<32x384xf32>
    %75 = arith.mulf %55, %74 : vector<32x384xf32>
    %76 = vector.extract_strided_slice %75 {offsets = [0, 0], sizes = [32, 128], strides = [1, 1]} : vector<32x384xf32> to vector<32x128xf32>
    %77 = vector.extract_strided_slice %75 {offsets = [0, 256], sizes = [32, 128], strides = [1, 1]} : vector<32x384xf32> to vector<32x128xf32>
    %78 = arith.truncf %76 : vector<32x128xf32> to vector<32x128xbf16>
    %c0_43 = arith.constant 0 : index
    %c0_44 = arith.constant 0 : index
    %79 = vector.load %arg23[%c0_43, %c0_44] : memref<32x512xbf16, #tpu.memory_space<vmem>>, vector<32x128xbf16>
    tpu.vector_store %arg23[%c0_43, %c0_44], %78 {strides = array<i32>} : memref<32x512xbf16, #tpu.memory_space<vmem>>, vector<32x128xbf16>,
    %80 = vector.extract_strided_slice %29 {offsets = [0, 0], sizes = [32, 128], strides = [1, 1]} : vector<32x384xf32> to vector<32x128xf32>
    %81 = arith.mulf %80, %77 : vector<32x128xf32>
    %82 = arith.truncf %81 : vector<32x128xf32> to vector<32x128xbf16>
    %c0_45 = arith.constant 0 : index
    %c128 = arith.constant 128 : index
    %83 = vector.load %arg23[%c0_45, %c128] : memref<32x512xbf16, #tpu.memory_space<vmem>>, vector<32x128xbf16>
    tpu.vector_store %arg23[%c0_45, %c128], %82 {strides = array<i32>} : memref<32x512xbf16, #tpu.memory_space<vmem>>, vector<32x128xbf16>,
    %84 = vector.extract_strided_slice %29 {offsets = [0, 128], sizes = [32, 128], strides = [1, 1]} : vector<32x384xf32> to vector<32x128xf32>
    %85 = arith.mulf %84, %77 : vector<32x128xf32>
    %86 = arith.truncf %85 : vector<32x128xf32> to vector<32x128xbf16>
    %c0_46 = arith.constant 0 : index
    %c256 = arith.constant 256 : index
    %87 = vector.load %arg23[%c0_46, %c256] : memref<32x512xbf16, #tpu.memory_space<vmem>>, vector<32x128xbf16>
    tpu.vector_store %arg23[%c0_46, %c256], %86 {strides = array<i32>} : memref<32x512xbf16, #tpu.memory_space<vmem>>, vector<32x128xbf16>,
    %88 = vector.extract_strided_slice %29 {offsets = [0, 256], sizes = [32, 128], strides = [1, 1]} : vector<32x384xf32> to vector<32x128xf32>
    %89 = arith.mulf %88, %77 : vector<32x128xf32>
    %90 = arith.truncf %89 : vector<32x128xf32> to vector<32x128xbf16>
    %c0_47 = arith.constant 0 : index
    %c384 = arith.constant 384 : index
    %91 = vector.load %arg23[%c0_47, %c384] : memref<32x512xbf16, #tpu.memory_space<vmem>>, vector<32x128xbf16>
    tpu.vector_store %arg23[%c0_47, %c384], %90 {strides = array<i32>} : memref<32x512xbf16, #tpu.memory_space<vmem>>, vector<32x128xbf16>,
    %c0_48 = arith.constant 0 : index
    %c0_49 = arith.constant 0 : index
    %92 = vector.load %arg23[%c0_48, %c0_49] : memref<32x512xbf16, #tpu.memory_space<vmem>>, vector<32x512xbf16>
    %cst_50 = arith.constant dense<0.000000e+00> : vector<16x512xf32>
    %93 = tpu.matmul %27, %92, %cst_50 {dimension_numbers = #tpu.dot_dimension_numbers<[1], [0], [0], [1], [0, 0, 1, 1], [], []>} : vector<16x32xbf16>, vector<32x512xbf16>, vector<16x512xf32> -> vector<16x512xf32>
    %94 = vector.extract_strided_slice %93 {offsets = [0, 0], sizes = [16, 128], strides = [1, 1]} : vector<16x512xf32> to vector<16x128xf32>
    %95 = arith.addf %11, %94 : vector<16x128xf32>
    %96 = vector.extract_strided_slice %93 {offsets = [0, 128], sizes = [16, 384], strides = [1, 1]} : vector<16x512xf32> to vector<16x384xf32>
    %97 = arith.truncf %95 : vector<16x128xf32> to vector<16x128xbf16>
    %c0_51 = arith.constant 0 : index
    %c0_52 = arith.constant 0 : index
    %c0_53 = arith.constant 0 : index
    %98 = vector.load %arg15[%c0_51, %c0_52, %c0_53] : memref<1x128x128xbf16, #tpu.memory_space<vmem>>, vector<1x128x128xbf16>
    %99 = vector.shape_cast %98 : vector<1x128x128xbf16> to vector<128x128xbf16>
    %cst_54 = arith.constant dense<0.000000e+00> : vector<16x128xf32>
    %100 = tpu.matmul %97, %99, %cst_54 {dimension_numbers = #tpu.dot_dimension_numbers<[1], [0], [0], [1], [0, 0, 1, 1], [], []>} : vector<16x128xbf16>, vector<128x128xbf16>, vector<16x128xf32> -> vector<16x128xf32>
    %c0_55 = arith.constant 0 : index
    %c0_56 = arith.constant 0 : index
    %c0_57 = arith.constant 0 : index
    %101 = vector.load %arg16[%c0_55, %c0_56, %c0_57] : memref<1x1x128xf32, #tpu.memory_space<vmem>>, vector<1x1x128xf32>
    %102 = vector.shape_cast %101 : vector<1x1x128xf32> to vector<1x128xf32>
    %103 = vector.broadcast %102 : vector<1x128xf32> to vector<16x128xf32>
    %104 = arith.addf %100, %103 : vector<16x128xf32>
    %105 = arith.negf %104 : vector<16x128xf32>
    %106 = math.exp %105 : vector<16x128xf32>
    %cst_58 = arith.constant 1.000000e+00 : f32
    %107 = vector.broadcast %cst_58 : f32 to vector<16x128xf32>
    %108 = arith.addf %107, %106 : vector<16x128xf32>
    %109 = arith.divf %107, %108 : vector<16x128xf32>
    %110 = arith.mulf %104, %109 : vector<16x128xf32>
    %111 = arith.truncf %110 : vector<16x128xf32> to vector<16x128xbf16>
    %c0_59 = arith.constant 0 : index
    %c0_60 = arith.constant 0 : index
    %c0_61 = arith.constant 0 : index
    %112 = vector.load %arg17[%c0_59, %c0_60, %c0_61] : memref<1x128x384xbf16, #tpu.memory_space<vmem>>, vector<1x128x384xbf16>
    %113 = vector.shape_cast %112 : vector<1x128x384xbf16> to vector<128x384xbf16>
    %cst_62 = arith.constant dense<0.000000e+00> : vector<16x384xf32>
    %114 = tpu.matmul %111, %113, %cst_62 {dimension_numbers = #tpu.dot_dimension_numbers<[1], [0], [0], [1], [0, 0, 1, 1], [], []>} : vector<16x128xbf16>, vector<128x384xbf16>, vector<16x384xf32> -> vector<16x384xf32>
    %c0_63 = arith.constant 0 : index
    %c0_64 = arith.constant 0 : index
    %c0_65 = arith.constant 0 : index
    %115 = vector.load %arg18[%c0_63, %c0_64, %c0_65] : memref<1x1x384xf32, #tpu.memory_space<vmem>>, vector<1x1x384xf32>
    %116 = vector.shape_cast %115 : vector<1x1x384xf32> to vector<1x384xf32>
    %117 = vector.broadcast %116 : vector<1x384xf32> to vector<16x384xf32>
    %118 = arith.addf %114, %117 : vector<16x384xf32>
    %119 = arith.truncf %118 : vector<16x384xf32> to vector<16x384xbf16>
    %c0_66 = arith.constant 0 : index
    %c0_67 = arith.constant 0 : index
    %120 = vector.load %arg22[%c0_66, %c0_67] : memref<16x768xbf16, #tpu.memory_space<vmem>>, vector<16x384xbf16>
    tpu.vector_store %arg22[%c0_66, %c0_67], %119 {strides = array<i32>} : memref<16x768xbf16, #tpu.memory_space<vmem>>, vector<16x384xbf16>,
    %121 = arith.truncf %96 : vector<16x384xf32> to vector<16x384xbf16>
    %c0_68 = arith.constant 0 : index
    %c384_69 = arith.constant 384 : index
    %122 = vector.load %arg22[%c0_68, %c384_69] : memref<16x768xbf16, #tpu.memory_space<vmem>>, vector<16x384xbf16>
    tpu.vector_store %arg22[%c0_68, %c384_69], %121 {strides = array<i32>} : memref<16x768xbf16, #tpu.memory_space<vmem>>, vector<16x384xbf16>,
    %c0_70 = arith.constant 0 : index
    %c0_71 = arith.constant 0 : index
    %123 = vector.load %arg22[%c0_70, %c0_71] : memref<16x768xbf16, #tpu.memory_space<vmem>>, vector<16x768xbf16>
    %cst_72 = arith.constant dense<0.000000e+00> : vector<32x768xf32>
    %124 = tpu.matmul %19, %123, %cst_72 {dimension_numbers = #tpu.dot_dimension_numbers<[1], [0], [0], [1], [0, 0, 1, 1], [], []>} : vector<32x16xbf16>, vector<16x768xbf16>, vector<32x768xf32> -> vector<32x768xf32>
    %125 = vector.extract_strided_slice %124 {offsets = [0, 0], sizes = [32, 384], strides = [1, 1]} : vector<32x768xf32> to vector<32x384xf32>
    %126 = vector.extract_strided_slice %124 {offsets = [0, 384], sizes = [32, 384], strides = [1, 1]} : vector<32x768xf32> to vector<32x384xf32>
    %c0_73 = arith.constant 0 : index
    %c0_74 = arith.constant 0 : index
    %127 = vector.load %arg5[%c0_73, %c0_74] : memref<32x16xf32, #tpu.memory_space<vmem>>, vector<32x16xf32>
    %c0_75 = arith.constant 0 : index
    %c0_76 = arith.constant 0 : index
    %c0_77 = arith.constant 0 : index
    %128 = vector.load %arg19[%c0_75, %c0_76, %c0_77] : memref<1x1x16xf32, #tpu.memory_space<vmem>>, vector<1x1x16xf32>
    %129 = vector.shape_cast %128 : vector<1x1x16xf32> to vector<1x16xf32>
    %130 = vector.broadcast %129 : vector<1x16xf32> to vector<32x16xf32>
    %131 = arith.mulf %127, %130 : vector<32x16xf32>
    %cst_78 = arith.constant dense<0.000000e+00> : vector<32xf32>
    %132 = vector.multi_reduction <add>, %131, %cst_78 [1] : vector<32x16xf32> to vector<32xf32>
    %133 = vector.shape_cast %132 : vector<32xf32> to vector<32x1xf32>
    %134 = arith.negf %133 : vector<32x1xf32>
    %135 = math.exp %134 : vector<32x1xf32>
    %cst_79 = arith.constant 1.000000e+00 : f32
    %136 = vector.broadcast %cst_79 : f32 to vector<32x1xf32>
    %137 = arith.addf %136, %135 : vector<32x1xf32>
    %138 = arith.divf %136, %137 : vector<32x1xf32>
    %cst_80 = arith.constant 1.000000e+00 : f32
    %139 = vector.broadcast %cst_80 : f32 to vector<32x1xf32>
    %140 = arith.subf %138, %139 : vector<32x1xf32>
    %141 = vector.broadcast %31 : vector<1x1xf32> to vector<32x1xf32>
    %142 = arith.mulf %141, %140 : vector<32x1xf32>
    %cst_81 = arith.constant 1.000000e+00 : f32
    %143 = vector.broadcast %cst_81 : f32 to vector<32x1xf32>
    %144 = arith.addf %143, %142 : vector<32x1xf32>
    %145 = vector.broadcast %144 : vector<32x1xf32> to vector<32x384xf32>
    %146 = arith.mulf %125, %145 : vector<32x384xf32>
    %147 = vector.extract_strided_slice %146 {offsets = [0, 0], sizes = [32, 128], strides = [1, 1]} : vector<32x384xf32> to vector<32x128xf32>
    %148 = vector.extract_strided_slice %146 {offsets = [0, 128], sizes = [32, 128], strides = [1, 1]} : vector<32x384xf32> to vector<32x128xf32>
    %149 = vector.extract_strided_slice %146 {offsets = [0, 256], sizes = [32, 128], strides = [1, 1]} : vector<32x384xf32> to vector<32x128xf32>
    %150 = arith.truncf %147 : vector<32x128xf32> to vector<32x128xbf16>
    %c0_82 = arith.constant 0 : index
    %c0_83 = arith.constant 0 : index
    %151 = vector.load %arg23[%c0_82, %c0_83] : memref<32x512xbf16, #tpu.memory_space<vmem>>, vector<32x128xbf16>
    tpu.vector_store %arg23[%c0_82, %c0_83], %150 {strides = array<i32>} : memref<32x512xbf16, #tpu.memory_space<vmem>>, vector<32x128xbf16>,
    %152 = vector.extract_strided_slice %29 {offsets = [0, 0], sizes = [32, 128], strides = [1, 1]} : vector<32x384xf32> to vector<32x128xf32>
    %153 = arith.mulf %152, %149 : vector<32x128xf32>
    %154 = vector.extract_strided_slice %126 {offsets = [0, 0], sizes = [32, 128], strides = [1, 1]} : vector<32x384xf32> to vector<32x128xf32>
    %155 = arith.mulf %154, %148 : vector<32x128xf32>
    %156 = arith.addf %153, %155 : vector<32x128xf32>
    %157 = arith.truncf %156 : vector<32x128xf32> to vector<32x128xbf16>
    %c0_84 = arith.constant 0 : index
    %c128_85 = arith.constant 128 : index
    %158 = vector.load %arg23[%c0_84, %c128_85] : memref<32x512xbf16, #tpu.memory_space<vmem>>, vector<32x128xbf16>
    tpu.vector_store %arg23[%c0_84, %c128_85], %157 {strides = array<i32>} : memref<32x512xbf16, #tpu.memory_space<vmem>>, vector<32x128xbf16>,
    %159 = vector.extract_strided_slice %29 {offsets = [0, 128], sizes = [32, 128], strides = [1, 1]} : vector<32x384xf32> to vector<32x128xf32>
    %160 = arith.mulf %159, %149 : vector<32x128xf32>
    %161 = vector.extract_strided_slice %126 {offsets = [0, 128], sizes = [32, 128], strides = [1, 1]} : vector<32x384xf32> to vector<32x128xf32>
    %162 = arith.mulf %161, %148 : vector<32x128xf32>
    %163 = arith.addf %160, %162 : vector<32x128xf32>
    %164 = arith.truncf %163 : vector<32x128xf32> to vector<32x128xbf16>
    %c0_86 = arith.constant 0 : index
    %c256_87 = arith.constant 256 : index
    %165 = vector.load %arg23[%c0_86, %c256_87] : memref<32x512xbf16, #tpu.memory_space<vmem>>, vector<32x128xbf16>
    tpu.vector_store %arg23[%c0_86, %c256_87], %164 {strides = array<i32>} : memref<32x512xbf16, #tpu.memory_space<vmem>>, vector<32x128xbf16>,
    %166 = vector.extract_strided_slice %29 {offsets = [0, 256], sizes = [32, 128], strides = [1, 1]} : vector<32x384xf32> to vector<32x128xf32>
    %167 = arith.mulf %166, %149 : vector<32x128xf32>
    %168 = vector.extract_strided_slice %126 {offsets = [0, 256], sizes = [32, 128], strides = [1, 1]} : vector<32x384xf32> to vector<32x128xf32>
    %169 = arith.mulf %168, %148 : vector<32x128xf32>
    %170 = arith.addf %167, %169 : vector<32x128xf32>
    %171 = arith.truncf %170 : vector<32x128xf32> to vector<32x128xbf16>
    %c0_88 = arith.constant 0 : index
    %c384_89 = arith.constant 384 : index
    %172 = vector.load %arg23[%c0_88, %c384_89] : memref<32x512xbf16, #tpu.memory_space<vmem>>, vector<32x128xbf16>
    tpu.vector_store %arg23[%c0_88, %c384_89], %171 {strides = array<i32>} : memref<32x512xbf16, #tpu.memory_space<vmem>>, vector<32x128xbf16>,
    %c0_90 = arith.constant 0 : index
    %c0_91 = arith.constant 0 : index
    %173 = vector.load %arg23[%c0_90, %c0_91] : memref<32x512xbf16, #tpu.memory_space<vmem>>, vector<32x512xbf16>
    %cst_92 = arith.constant dense<0.000000e+00> : vector<16x512xf32>
    %174 = tpu.matmul %27, %173, %cst_92 {dimension_numbers = #tpu.dot_dimension_numbers<[1], [0], [0], [1], [0, 0, 1, 1], [], []>} : vector<16x32xbf16>, vector<32x512xbf16>, vector<16x512xf32> -> vector<16x512xf32>
    %175 = vector.extract_strided_slice %174 {offsets = [0, 128], sizes = [16, 384], strides = [1, 1]} : vector<16x512xf32> to vector<16x384xf32>
    %176 = arith.addf %96, %175 : vector<16x384xf32>
    %177 = tpu.iota {dimensions = array<i32: 0>} : vector<2x16xi32>
    %c0_93 = arith.constant 0 : index
    %c0_94 = arith.constant 0 : index
    %178 = vector.load %arg4[%c0_93, %c0_94] : memref<1x16xi32, #tpu.memory_space<vmem>>, vector<1x16xi32>
    %179 = vector.broadcast %178 : vector<1x16xi32> to vector<2x16xi32>
    %180 = arith.cmpi eq, %177, %179 : vector<2x16xi32>
    %181 = arith.extui %180 : vector<2x16xi1> to vector<2x16xi32>
    %182 = arith.sitofp %181 : vector<2x16xi32> to vector<2x16xf32>
    %183 = arith.truncf %182 : vector<2x16xf32> to vector<2x16xbf16>
    %184 = arith.truncf %176 : vector<16x384xf32> to vector<16x384xbf16>
    %cst_95 = arith.constant dense<0.000000e+00> : vector<2x384xf32>
    %185 = tpu.matmul %183, %184, %cst_95 {dimension_numbers = #tpu.dot_dimension_numbers<[1], [0], [0], [1], [0, 0, 1, 1], [], []>} : vector<2x16xbf16>, vector<16x384xbf16>, vector<2x384xf32> -> vector<2x384xf32>
    %c0_96 = arith.constant 0 : index
    %c0_97 = arith.constant 0 : index
    %c0_98 = arith.constant 0 : index
    %186 = vector.load %arg20[%c0_96, %c0_97, %c0_98] : memref<1x1x384xf32, #tpu.memory_space<vmem>>, vector<1x1x384xf32>
    %187 = vector.shape_cast %186 : vector<1x1x384xf32> to vector<1x384xf32>
    %188 = vector.broadcast %187 : vector<1x384xf32> to vector<2x384xf32>
    %189 = arith.mulf %185, %188 : vector<2x384xf32>
    %190 = vector.extract_strided_slice %189 {offsets = [0, 0], sizes = [2, 128], strides = [1, 1]} : vector<2x384xf32> to vector<2x128xf32>
    %cst_99 = arith.constant dense<0.000000e+00> : vector<2xf32>
    %191 = vector.multi_reduction <add>, %190, %cst_99 [1] : vector<2x128xf32> to vector<2xf32>
    %192 = vector.shape_cast %191 : vector<2xf32> to vector<2x1xf32>
    %193 = vector.extract_strided_slice %189 {offsets = [0, 128], sizes = [2, 128], strides = [1, 1]} : vector<2x384xf32> to vector<2x128xf32>
    %cst_100 = arith.constant dense<0.000000e+00> : vector<2xf32>
    %194 = vector.multi_reduction <add>, %193, %cst_100 [1] : vector<2x128xf32> to vector<2xf32>
    %195 = vector.shape_cast %194 : vector<2xf32> to vector<2x1xf32>
    %196 = vector.extract_strided_slice %189 {offsets = [0, 256], sizes = [2, 128], strides = [1, 1]} : vector<2x384xf32> to vector<2x128xf32>
    %cst_101 = arith.constant dense<0.000000e+00> : vector<2xf32>
    %197 = vector.multi_reduction <add>, %196, %cst_101 [1] : vector<2x128xf32> to vector<2xf32>
    %198 = vector.shape_cast %197 : vector<2xf32> to vector<2x1xf32>
    %199 = tpu.concatenate %192, %195, %198 in 1 : vector<2x1xf32>, vector<2x1xf32>, vector<2x1xf32> -> vector<2x3xf32>
    %c0_102 = arith.constant 0 : index
    %c0_103 = arith.constant 0 : index
    %c0_104 = arith.constant 0 : index
    %200 = vector.load %arg21[%c0_102, %c0_103, %c0_104] : memref<1x2x3xf32, #tpu.memory_space<vmem>>, vector<1x2x3xf32>
    %201 = vector.shape_cast %200 : vector<1x2x3xf32> to vector<2x3xf32>
    %202 = vector.shape_cast %199 : vector<2x3xf32> to vector<1x2x3xf32>
    tpu.vector_store %arg21[%c0_102, %c0_103, %c0_104], %202 {strides = array<i32>} : memref<1x2x3xf32, #tpu.memory_space<vmem>>, vector<1x2x3xf32>,
    return
  }
  func.func @transform_0(%arg0: i32) -> (i32, i32) {
    %c0_i32 = arith.constant 0 : i32
    %c0_i32_0 = arith.constant 0 : i32
    %c0_i32_1 = arith.constant 0 : i32
    return %c0_i32, %c0_i32_0 : i32, i32
  }
  func.func @transform_1(%arg0: i32) -> (i32, i32) {
    %c0_i32 = arith.constant 0 : i32
    %c0_i32_0 = arith.constant 0 : i32
    %c0_i32_1 = arith.constant 0 : i32
    return %c0_i32, %c0_i32_0 : i32, i32
  }
  func.func @transform_2(%arg0: i32) -> (i32, i32) {
    %c0_i32 = arith.constant 0 : i32
    %c0_i32_0 = arith.constant 0 : i32
    %c0_i32_1 = arith.constant 0 : i32
    return %c0_i32, %c0_i32_0 : i32, i32
  }
  func.func @transform_3(%arg0: i32) -> (i32, i32) {
    %c0_i32 = arith.constant 0 : i32
    %c0_i32_0 = arith.constant 0 : i32
    %c0_i32_1 = arith.constant 0 : i32
    return %c0_i32, %c0_i32_0 : i32, i32
  }
  func.func @transform_4(%arg0: i32) -> (i32, i32) {
    %c0_i32 = arith.constant 0 : i32
    %c0_i32_0 = arith.constant 0 : i32
    %c0_i32_1 = arith.constant 0 : i32
    return %c0_i32, %c0_i32_0 : i32, i32
  }
  func.func @transform_5(%arg0: i32) -> (i32, i32, i32) {
    %c0_i32 = arith.constant 0 : i32
    %c0_i32_0 = arith.constant 0 : i32
    %c0_i32_1 = arith.constant 0 : i32
    return %arg0, %c0_i32, %c0_i32_0 : i32, i32, i32
  }
  func.func @transform_6(%arg0: i32) -> (i32, i32, i32) {
    %c0_i32 = arith.constant 0 : i32
    %c0_i32_0 = arith.constant 0 : i32
    %c0_i32_1 = arith.constant 0 : i32
    return %arg0, %c0_i32, %c0_i32_0 : i32, i32, i32
  }
  func.func @transform_7(%arg0: i32) -> (i32, i32, i32) {
    %c0_i32 = arith.constant 0 : i32
    %c0_i32_0 = arith.constant 0 : i32
    %c0_i32_1 = arith.constant 0 : i32
    return %arg0, %c0_i32, %c0_i32_0 : i32, i32, i32
  }
  func.func @transform_8(%arg0: i32) -> (i32, i32, i32) {
    %c0_i32 = arith.constant 0 : i32
    %c0_i32_0 = arith.constant 0 : i32
    %c0_i32_1 = arith.constant 0 : i32
    return %arg0, %c0_i32, %c0_i32_0 : i32, i32, i32
  }
  func.func @transform_9(%arg0: i32) -> (i32, i32, i32) {
    %c0_i32 = arith.constant 0 : i32
    %c0_i32_0 = arith.constant 0 : i32
    %c0_i32_1 = arith.constant 0 : i32
    return %arg0, %c0_i32, %c0_i32_0 : i32, i32, i32
  }
  func.func @transform_10(%arg0: i32) -> (i32, i32, i32) {
    %c0_i32 = arith.constant 0 : i32
    %c0_i32_0 = arith.constant 0 : i32
    %c0_i32_1 = arith.constant 0 : i32
    return %arg0, %c0_i32, %c0_i32_0 : i32, i32, i32
  }
  func.func @transform_11(%arg0: i32) -> (i32, i32, i32) {
    %c0_i32 = arith.constant 0 : i32
    %c0_i32_0 = arith.constant 0 : i32
    %c0_i32_1 = arith.constant 0 : i32
    return %arg0, %c0_i32, %c0_i32_0 : i32, i32, i32
  }
  func.func @transform_12(%arg0: i32) -> (i32, i32, i32) {
    %c0_i32 = arith.constant 0 : i32
    %c0_i32_0 = arith.constant 0 : i32
    %c0_i32_1 = arith.constant 0 : i32
    return %arg0, %c0_i32, %c0_i32_0 : i32, i32, i32
  }
  func.func @transform_13(%arg0: i32) -> (i32, i32, i32) {
    %c0_i32 = arith.constant 0 : i32
    %c0_i32_0 = arith.constant 0 : i32
    %c0_i32_1 = arith.constant 0 : i32
    return %arg0, %c0_i32, %c0_i32_0 : i32, i32, i32
  }
  func.func @transform_14(%arg0: i32) -> (i32, i32, i32) {
    %c0_i32 = arith.constant 0 : i32
    %c0_i32_0 = arith.constant 0 : i32
    %c0_i32_1 = arith.constant 0 : i32
    return %arg0, %c0_i32, %c0_i32_0 : i32, i32, i32
  }
  func.func @transform_15(%arg0: i32) -> (i32, i32, i32) {
    %c0_i32 = arith.constant 0 : i32
    %c0_i32_0 = arith.constant 0 : i32
    %c0_i32_1 = arith.constant 0 : i32
    return %arg0, %c0_i32, %c0_i32_0 : i32, i32, i32
  }
  func.func @transform_16(%arg0: i32) -> (i32, i32, i32) {
    %c0_i32 = arith.constant 0 : i32
    %c0_i32_0 = arith.constant 0 : i32
    %c0_i32_1 = arith.constant 0 : i32
    return %arg0, %c0_i32, %c0_i32_0 : i32, i32, i32
  }
  func.func @transform_17(%arg0: i32) -> (i32, i32, i32) {
    %c0_i32 = arith.constant 0 : i32
    %c0_i32_0 = arith.constant 0 : i32
    %c0_i32_1 = arith.constant 0 : i32
    return %arg0, %c0_i32, %c0_i32_0 : i32, i32, i32
  }
  func.func @transform_18(%arg0: i32) -> (i32, i32, i32) {
    %c0_i32 = arith.constant 0 : i32
    %c0_i32_0 = arith.constant 0 : i32
    %c0_i32_1 = arith.constant 0 : i32
    return %arg0, %c0_i32, %c0_i32_0 : i32, i32, i32
  }
  func.func @transform_19(%arg0: i32) -> (i32, i32, i32) {
    %c0_i32 = arith.constant 0 : i32
    %c0_i32_0 = arith.constant 0 : i32
    %c0_i32_1 = arith.constant 0 : i32
    return %arg0, %c0_i32, %c0_i32_0 : i32, i32, i32
  }
  func.func @transform_20(%arg0: i32) -> (i32, i32, i32) {
    %c0_i32 = arith.constant 0 : i32
    %c0_i32_0 = arith.constant 0 : i32
    %c0_i32_1 = arith.constant 0 : i32
    return %arg0, %c0_i32, %c0_i32_0 : i32, i32, i32
  }
}

</mosaic_0001>

<bundles_post_ra>
// kernel: molnet_eq_dipole_forward.1
= control target key start
LH: loop header
LB: loop body
LE: loop exit
PB: predicated region body
PF: predicated region fallthrough
CT: control target
= control target key end

     0   :  { %s3954_s0 = inlined_call_operand.vmem [shape: bf16[16,64], index: 0, kind: input, shape index: {}]   ;;  %s3955_s1 = inlined_call_operand.vmem [shape: bf16[64,128], index: 1, kind: input, shape index: {}]   ;;  %s3956_s2 = inlined_call_operand.vmem [shape: f32[1,128], index: 2, kind: input, shape index: {}]   ;;  %s3957_s3 = inlined_call_operand.vmem [shape: s32[1,16], index: 3, kind: input, shape index: {}]   ;;  %s3958_s4 = inlined_call_operand.vmem [shape: f32[32,16], index: 4, kind: input, shape index: {}]   ;;  %s3959_s5 = inlined_call_operand.vmem [shape: s32[2,32,1], index: 5, kind: input, shape index: {}]   ;;  %s3960_s6 = inlined_call_operand.vmem [shape: s32[2,1,32], index: 6, kind: input, shape index: {}]   ;;  %s3961_s7 = inlined_call_operand.vmem [shape: f32[2,32,384], index: 7, kind: input, shape index: {}]   ;;  %s3962_s8 = inlined_call_operand.vmem [shape: f32[2,1,1], index: 8, kind: input, shape index: {}]   ;;  %s3963_s9 = inlined_call_operand.vmem [shape: bf16[2,128,128], index: 9, kind: input, shape index: {}]   ;;  %s3964_s10 = inlined_call_operand.vmem [shape: f32[2,1,128], index: 10, kind: input, shape index: {}]   ;;  %s3965_s11 = inlined_call_operand.vmem [shape: bf16[2,128,384], index: 11, kind: input, shape index: {}]   ;;  %s3966_s12 = inlined_call_operand.vmem [shape: f32[2,1,384], index: 12, kind: input, shape index: {}]   ;;  %s3967_s13 = inlined_call_operand.vmem [shape: f32[2,1,16], index: 13, kind: input, shape index: {}]   ;;  %s3968_s14 = inlined_call_operand.vmem [shape: bf16[2,128,128], index: 14, kind: input, shape index: {}]   ;;  %s3969_s15 = inlined_call_operand.vmem [shape: f32[2,1,128], index: 15, kind: input, shape index: {}]   ;;  %s3970_s16 = inlined_call_operand.vmem [shape: bf16[2,128,384], index: 16, kind: input, shape index: {}]   ;;  %s3971_s17 = inlined_call_operand.vmem [shape: f32[2,1,384], index: 17, kind: input, shape index: {}]   ;;  %s3972_s18 = inlined_call_operand.vmem [shape: f32[2,1,16], index: 18, kind: input, shape index: {}]   ;;  %s3973_s19 = inlined_call_operand.vmem [shape: f32[2,1,384], index: 19, kind: input, shape index: {}]   ;;  %s3974_s20 = inlined_call_operand.vmem [shape: f32[2,2,3], index: 20, kind: output, shape index: {}]  }
   0x1   :  { %3977 = sst [smem:[#allocation4_spill]] %s3954_s0 }
   0x2   :  { %3978 = sst [smem:[#allocation5_spill]] %s3955_s1  ;;  %s3409_s1 = smov 0  }
   0x3   :  { %3979 = sst [smem:[#allocation6_spill]] %s3956_s2 }
   0x4   :  { %3980 = sst [smem:[#allocation7_spill]] %s3957_s3 }
   0x5   :  { %3981 = sst [smem:[#allocation8_spill]] %s3958_s4 }
   0x6 LB: > { %s2733_s22 = sadd.s32 4294967295, %s3300_s1   ;;  %p2737_p0 = scmp.ge.s32.totalorder %s3300_s1, 1  ;;  %s3300_s1 = sphi %s3409_s1, %s30_s1  }
   0x7   : > { %p687_p1 = scmp.lt.s32.totalorder %s3300_s1, 3 }
   0x9   : > { %p688_p2 = pnand %p2737_p0, %p687_p1 }
   0xa   : > { %s3982_s2 = sld [smem:[#allocation5_spill]] (!%p688_p2)  ;;  %p799_p3 = scmp.lt.s32.totalorder (!%p688_p2), %s2733_s22, 1 }
   0xb   : > { %691 = sbr.rel (%p688_p2) target bundleno = 1762 (0x6e2), region = 100  ;;  %s3983_s3 = sld [smem:[#allocation8_spill]] (!%p688_p2) }
   0xc   : > { %s3984_s21 = sld [smem:[#allocation4_spill]] (!%p688_p2) }
  0x10   : > { %v3137_v0 = vld [vmem:[%s3982_s2 + $0x18] sm:$0xff]  ;;  %v3302_v1 = vmov 0   ;;  %v3136_v2 = vld [vmem:[%s3982_s2 + $0x10] sm:$0xff]  ;;  %s3996_s22 = smov (!%p799_p3, %s2733_s22), 1  ;;  %v3135_v3 = vld [vmem:[%s3982_s2 + $0x8] sm:$0xff]  ;;  %vm1310_vm0 = vcmask 130048   ;;  %v965_v48 = vlaneseq }
  0x11   : > { %3227 = vset.pattern.permute.xlu0 %v3302_v1  ;;  %3228 = vset.pattern.permute.xlu1 %v3302_v1  ;;  %s3130_s26 = sshll.u32 %s3996_s22, 5  ;;  %s834_s23 = scalar_lea.vmem %s3967_s13, %s3996_s22  ;;  %v3439_v6 = vld [vmem:[%s3983_s3 + $0x10] sm:$0xff]  ;;  %v3134_v9 = vld [vmem:[%s3982_s2] sm:$0xff]  ;;  %v3448_v10 = vld [vmem:[%s3983_s3 + $0x18] sm:$0xff]  ;;  %vm907_vm1 = vcmask 523264   ;;  %v3303_v61 = vmov 0.0  }
  0x12   : > { %915 = vmatpush.bf16.msra.mxu0 %v3137_v0  ;;  %3229 = vset.pattern.permute.xlu2 %v3302_v1  ;;  %s803_s4 = scalar_lea.vmem %s3959_s5, %s3130_s26  ;;  %v3230_v7 = vld [vmem:[%s834_s23] ss:$0 sm:$0xff]  ;;  %v3464_v18 = vld [vmem:[%s3983_s3 + $0x8] sm:$0xff]  ;;  %s806_s28 = scalar_lea.vmem %s3960_s6, %s3996_s22  ;;  %v966_v51 = vand.u32 127, %v965_v48 }
  0x13   : > { %v967_v4 = vld [vmem:[%s803_s4] sm:$0xff]  ;;  %v969_v5 = vld [vmem:[%s803_s4 + $0x10] sm:$0xff]  ;;  %v1365_v8 = vmul.f32 %v3230_v7, %v3439_v6  ;;  %v968_v12 = vld [vmem:[%s803_s4 + $0x8] sm:$0xff]  ;;  %v1366_v15 = vmul.f32 %v3230_v7, %v3448_v10  ;;  %v1364_v20 = vmul.f32 %v3230_v7, %v3464_v18  ;;  %s814_s0 = scalar_lea.vmem %s3962_s8, %s3996_s22  ;;  %s854_s23 = scalar_lea.vmem %s3972_s18, %s3996_s22 }
  0x14   : > { %972 = vperm.xlu0 %3227, %v967_v4   ;;  %978 = vperm.xlu1 %3228, %v969_v5   ;;  %v970_v13 = vld [vmem:[%s803_s4 + $0x18] sm:$0xff]  ;;  %v3133_v14 = vld [vmem:[%s3984_s21] sm:$0xff]  ;;  %s3131_s24 = sshll.u32 %s3996_s22, 6  ;;  %s822_s21 = scalar_lea.vmem %s3964_s10, %s3996_s22 }
  0x15   : > { %v1373_v11 = vsel %vm1310_vm0, %v1365_v8, 0.0  ;;  %v1376_v16 = vsel %vm1310_vm0, %v1366_v15, 0.0  ;;  %v3459_v17 = vld [vmem:[%s3983_s3] sm:$0xff]  ;;  %v1370_v22 = vsel %vm1310_vm0, %v1364_v20, 0.0  ;;  %s3488_s27 = scalar_lea.vmem %s3963_s9, %s3131_s24  ;;  %s3985_s26 = sld [smem:[#allocation6_spill]] }
  0x16   : > { %916 = vmatpush.bf16.msra.mxu0 %v3136_v2  ;;  %1374 = vadd.xlane.f32.xlu2 %v1373_v11  ;;  %v1363_v19 = vmul.f32 %v3230_v7, %v3459_v17  ;;  %v3145_v23 = vld [vmem:[%s3488_s27 + $0x38] sm:$0xff]  ;;  %v3144_v24 = vld [vmem:[%s3488_s27 + $0x30] sm:$0xff]  ;;  %v3143_v27 = vld [vmem:[%s3488_s27 + $0x28] sm:$0xff]  ;;  %s3214_s25 = smul.u32 96, %s3996_s22 }
  0x17   : > { %1091 = vmatpush.bf16.msra.mxu1 %v3145_v23  ;;  %v3142_v28 = vld [vmem:[%s3488_s27 + $0x20] sm:$0xff]  ;;  %v3141_v32 = vld [vmem:[%s3488_s27 + $0x18] sm:$0xff]  ;;  %v3140_v35 = vld [vmem:[%s3488_s27 + $0x10] sm:$0xff] }
  0x18   : > { %v1367_v21 = vsel %vm1310_vm0, %v1363_v19, 0.0  ;;  %v3139_v39 = vld [vmem:[%s3488_s27 + $0x8] sm:$0xff]  ;;  %v3138_v47 = vld [vmem:[%s3488_s27] sm:$0xff]  ;;  %s3695_s29 = scalar_lea.vmem %s3961_s7, %s3214_s25  ;;  %s842_s27 = scalar_lea.vmem %s3969_s15, %s3996_s22 }
  0x1a   : > { %917 = vmatpush.bf16.msra.mxu0 %v3135_v3 }
  0x1b   : > { %1092 = vmatpush.bf16.msra.mxu1 %v3144_v24  ;;  %v3231_v34 = vld [vmem:[%s3985_s26] ss:$0 sm:$0xff] }
  0x1c   : > { %975 = vperm.xlu0 %3227, %v968_v12   ;;  %981 = vperm.xlu1 %3228, %v970_v13  }
  0x1e   : > { %918 = vmatpush.bf16.msra.mxu0 %v3134_v9  ;;  %1377 = vadd.xlane.f32.xlu2 %v1376_v16  ;;  %v3530_v9 = vld [vmem:[%s814_s0] ss:$0 sm:$0xff]  ;;  %s3215_s0 = smul.u32 192, %s3996_s22 }
  0x1f   : > { %1093 = vmatpush.bf16.msra.mxu1 %v3143_v27 }
  0x20   : > { %s3590_s26 = scalar_lea.vmem %s3965_s11, %s3215_s0  ;;  %s3799_s4 = scalar_lea.vmem %s3970_s16, %s3215_s0 }
  0x21   : > { %2768 = vmatmul.msk.bf16.vlgmr.msra.gmra.mxu0 %vm907_vm1, %v3133_v14  ;;  %v3539_v14 = vld [vmem:[%s854_s23] ss:$0 sm:$0xff] }
  0x22   : > { %v2163_v24 = vmul.f32 %v3539_v14, %v3448_v10 }
  0x23   : > { %1094 = vmatpush.bf16.msra.mxu1 %v3142_v28 }
  0x27   : > { %1095 = vmatpush.bf16.msra.mxu1 %v3141_v32  ;;  %v2173_v32 = vsel %vm1310_vm0, %v2163_v24, 0.0 }
  0x2b   : > { %1096 = vmatpush.bf16.msra.mxu1 %v3140_v35 }
  0x2f   : > { %1097 = vmatpush.bf16.msra.mxu1 %v3139_v39 }
  0x33   : > { %1098 = vmatpush.bf16.msra.mxu1 %v3138_v47 }
  0x46   : > { %1368 = vadd.xlane.f32.xlu0 %v1367_v21  ;;  %1371 = vadd.xlane.f32.xlu1 %v1370_v22 }
  0x4e   : > { %2174 = vadd.xlane.f32.xlu1 %v2173_v32 }
  0x86   : > { %v973_v44 = vpop.permute.xlu0 %972  ;;  %v979_v45 = vpop.permute.xlu1 %978 }
  0x87   : > { %vm983_vm2 = vcmp.eq.s32.totalorder %v966_v51, %v973_v44  ;;  %vm985_vm5 = vcmp.eq.s32.totalorder %v966_v51, %v979_v45 }
  0x88   : > { %v2771_v62 = vsel %vm983_vm2, 1.0, %v3303_v61  ;;  %v2773_v3 = vsel %vm985_vm5, 1.0, %v3303_v61 }
  0x89   : > { %v1375_v25 = vpop.xlane.xlu2 %1374 }
  0x8a   : > { %v2881_v26 = vmul.f32 -1.442695, %v1375_v25  ;;  %v2162_v25 = vmul.f32 %v3539_v14, %v3439_v6 }
  0x8c   : > { %3238 = vpow2.f32 %v2881_v26 }
  0x8e   : > { %v976_v63 = vpop.permute.xlu0 %975  ;;  %v982_v0 = vpop.permute.xlu1 %981 }
  0x8f   : > { %vm984_vm8 = vcmp.eq.s32.totalorder %v966_v51, %v976_v63  ;;  %vm986_vm9 = vcmp.eq.s32.totalorder %v966_v51, %v982_v0 }
  0x90   : > { %v2772_v4 = vsel %vm984_vm8, 1.0, %v3303_v61  ;;  %v2774_v7 = vsel %vm986_vm9, 1.0, %v3303_v61 }
  0x91   : > { %v1378_v29 = vpop.xlane.xlu2 %1377  ;;  %v3522_v5 = vpack.c.bf16 %v2772_v4, %v2771_v62  ;;  %v3532_v12 = vpack.c.bf16 %v2774_v7, %v2773_v3 }
  0x92   : > { %v3239_v30 = vpop.eup %3238  ;;  %v2882_v31 = vmul.f32 -1.442695, %v1378_v29 }
  0x93   : > { %v1393_v33 = vadd.f32 1.0, %v3239_v30 }
  0x94   : > { %3240 = vpow2.f32 %v2882_v31 }
  0x95   : > { %3242 = vrcp.f32 %v1393_v33  ;;  %v1434_v53 = vand.u32 2147483647, %v1393_v33  ;;  %v1436_v54 = vand.u32 2147483648, %v1393_v33  ;;  %vm1430_vm3 = vweird.f32 %v1393_v33 }
  0x97   : > { %vm1435_vm7 = vcmp.eq.f32.partialorder %v1434_v53, 8.507059e+37  ;;  %v1437_v1 = vor.u32 1.1754944e-38, %v1436_v54 }
  0x9a   : > { %v3241_v38 = vpop.eup %3240 }
  0x9b   : > { %v3243_v40 = vpop.eup %3242  ;;  %v3507_v42 = vadd.f32 1.0, %v3241_v38 }
  0x9c   : > { %v1426_v43 = vmul.f32 %v3243_v40, %v1393_v33  ;;  %vm1431_vm4 = vweird.f32 %v3243_v40  ;;  %v2170_v33 = vsel %vm1310_vm0, %v2162_v25, 0.0 }
  0x9d   : > { %vm1432_vm6 = vmor %vm1430_vm3, %vm1431_vm4  ;;  %vm1445_vm10 = vweird.f32 %v3507_v42  ;;  %v1449_v21 = vand.u32 2147483647, %v3507_v42  ;;  %v1451_v26 = vand.u32 2147483648, %v3507_v42  ;;  %2171 = vadd.xlane.f32.xlu0 %v2170_v33 }
  0x9e   : > { %v920_v36 = vpop.f32.mrf.mxu0  ;;  %v1427_v46 = vsub.f32 1.0, %v1426_v43 }
  0x9f   : > { %v3503_v37 = vadd.f32 %v3231_v34, %v920_v36  ;;  %vm1450_vm13 = vcmp.eq.f32.partialorder %v1449_v21, 8.507059e+37  ;;  %v1452_v6 = vor.u32 1.1754944e-38, %v1451_v26 }
  0xa0   : > { %v1428_v52 = vmul.f32 %v3243_v40, %v1427_v46 }
  0xa1   : > { %v2769_v41 = vmul.f32 -1.442695, %v3503_v37 }
  0xa2   : > { %v1429_v60 = vadd.f32 %v3243_v40, %v1428_v52 }
  0xa3   : > { %3244 = vpow2.f32 %v2769_v41 }
  0xa4   : > { %3246 = vrcp.f32 %v3507_v42  ;;  %v1433_v8 = vsel %vm1432_vm6, %v3243_v40, %v1429_v60 }
  0xa5   : > { %v1438_v13 = vsel %vm1435_vm7, %v1437_v1, %v1433_v8 }
  0xa6   : > { %v922_v49 = vpop.f32.mrf.mxu0  ;;  %v2885_v16 = vadd.f32 -1.0, %v1438_v13 }
  0xa7   : > { %v3511_v50 = vadd.f32 %v3231_v34, %v922_v49  ;;  %v2161_v34 = vmul.f32 %v3539_v14, %v3464_v18 }
  0xa8   : > { %v1464_v28 = vmul.f32 %v3530_v9, %v2885_v16 }
  0xa9   : > { %v3245_v55 = vpop.eup %3244  ;;  %v2770_v56 = vmul.f32 -1.442695, %v3511_v50 }
  0xaa   : > { %v3247_v57 = vpop.eup %3246  ;;  %v3515_v58 = vadd.f32 1.0, %v3245_v55  ;;  %v1468_v31 = vadd.f32 1.0, %v1464_v28 }
  0xab   : > { %3248 = vpow2.f32 %v2770_v56  ;;  %v1441_v59 = vmul.f32 %v3247_v57, %v3507_v42  ;;  %vm1446_vm11 = vweird.f32 %v3247_v57  ;;  %v2167_v42 = vsel %vm1310_vm0, %v2161_v34, 0.0 }
  0xac   : > { %3250 = vrcp.f32 %v3515_v58  ;;  %vm3542_vm12 = vmor %vm1445_vm10, %vm1446_vm11  ;;  %1482 = vperm.xlu2 %3229, %v1468_v31   ;;  %v942_v43 = vand.u32 2147483647, %v3515_v58  ;;  %v944_v44 = vand.u32 2147483648, %v3515_v58  ;;  %vm938_vm15 = vweird.f32 %v3515_v58  ;;  %2168 = vadd.xlane.f32.xlu0 %v2167_v42 }
  0xad   : > { %v1442_v2 = vsub.f32 1.0, %v1441_v59 }
  0xae   : > { %vm943_vm3 = vcmp.eq.f32.partialorder %v942_v43, 8.507059e+37  ;;  %v2873_v43 = vld [vmem:[%s3590_s26 + $0xb0] sm:$0xf] }
  0xaf   : > { %v1443_v11 = vmul.f32 %v3247_v57, %v1442_v2 }
  0xb1   : > { %v3249_v15 = vpop.eup %3248  ;;  %v1444_v19 = vadd.f32 %v3247_v57, %v1443_v11 }
  0xb2   : > { %v3251_v22 = vpop.eup %3250  ;;  %v932_v23 = vadd.f32 1.0, %v3249_v15 }
  0xb3   : > { %v934_v27 = vmul.f32 %v3251_v22, %v3515_v58  ;;  %v1448_v29 = vsel %vm3542_vm12, %v3247_v57, %v1444_v19  ;;  %vm939_vm14 = vweird.f32 %v3251_v22  ;;  %v945_v57 = vor.u32 1.1754944e-38, %v944_v44 }
  0xb4   : > { %3252 = vrcp.f32 %v932_v23  ;;  %v1453_v35 = vsel %vm1450_vm13, %v1452_v6, %v1448_v29  ;;  %vm3565_vm1 = vmor %vm938_vm15, %vm939_vm14  ;;  %v957_v52 = vand.u32 2147483647, %v932_v23  ;;  %v959_v53 = vand.u32 2147483648, %v932_v23 }
  0xb5   : > { %v935_v30 = vsub.f32 1.0, %v934_v27  ;;  %v2886_v36 = vadd.f32 -1.0, %v1453_v35  ;;  %vm953_vm4 = vweird.f32 %v932_v23 }
  0xb6   : > { %v960_v60 = vor.u32 1.1754944e-38, %v959_v53  ;;  %vm958_vm6 = vcmp.eq.f32.partialorder %v957_v52, 8.507059e+37  ;;  %v2861_v52 = vld [vmem:[%s3590_s26 + $0x90] sm:$0xf]  ;;  %v3158_v53 = vld [vmem:[%s3590_s26 + $0x98] sm:$0xf0] }
  0xb7   : > { %v936_v10 = vmul.f32 %v3251_v22, %v935_v30  ;;  %v1465_v41 = vmul.f32 %v3530_v9, %v2886_v36 }
  0xb9   : > { %v937_v39 = vadd.f32 %v3251_v22, %v936_v10  ;;  %v1369_v45 = vpop.xlane.xlu0 %1368  ;;  %v1372_v46 = vpop.xlane.xlu1 %1371  ;;  %v1469_v54 = vadd.f32 1.0, %v1465_v41 }
  0xba   : > { %v3253_v38 = vpop.eup %3252  ;;  %v2879_v18 = vmul.f32 -1.442695, %v1369_v45  ;;  %v2880_v49 = vmul.f32 -1.442695, %v1372_v46  ;;  %v3161_v45 = vld [vmem:[%s3590_s26 + $0xb8] sm:$0xf0] }
  0xbb   : > { %v949_v40 = vmul.f32 %v3253_v38, %v932_v23  ;;  %v941_v55 = vsel %vm3565_vm1, %v3251_v22, %v937_v39  ;;  %vm954_vm2 = vweird.f32 %v3253_v38  ;;  %1487 = vperm.xlu2 %3229, %v1469_v54   ;;  %v2862_v54 = vor.u32 %v3158_v53, %v2861_v52 }
  0xbc   : > { %3254 = vpow2.f32 %v2879_v18  ;;  %v946_v59 = vsel %vm943_vm3, %v945_v57, %v941_v55  ;;  %vm955_vm5 = vmor %vm953_vm4, %vm954_vm2  ;;  %v2865_v55 = vld [vmem:[%s3590_s26 + $0x98] sm:$0xf] }
  0xbd   : > { %v950_v47 = vsub.f32 1.0, %v949_v40  ;;  %3256 = vpow2.f32 %v2880_v49  ;;  %v3572_v1 = vmul.f32 %v946_v59, %v3503_v37  ;;  %v3156_v59 = vld [vmem:[%s3590_s26 + $0x80] sm:$0xf0] }
  0xbf   : > { %v951_v56 = vmul.f32 %v3253_v38, %v950_v47  ;;  %v2874_v47 = vor.u32 %v3161_v45, %v2873_v43 }
  0xc1   : > { %v952_v58 = vadd.f32 %v3253_v38, %v951_v56  ;;  %v2175_v40 = vpop.xlane.xlu1 %2174  ;;  %1294 = vmatpush.bf16.msra.mxu3 %v2874_v47  ;;  %v3159_v56 = vld [vmem:[%s3590_s26 + $0xa0] sm:$0xf0] }
  0xc2   : > { %v3255_v0 = vpop.eup %3254  ;;  %v3092_v42 = vmul.f32 -1.442695, %v2175_v40  ;;  %v2866_v57 = vor.u32 %v3159_v56, %v2865_v55  ;;  %v3148_v47 = vld [vmem:[%s3590_s26 + $0x20] sm:$0xf0] }
  0xc3   : > { %v956_v62 = vsel %vm955_vm5, %v3253_v38, %v952_v58  ;;  %v3257_v3 = vpop.eup %3256  ;;  %v1391_v4 = vadd.f32 1.0, %v3255_v0  ;;  %v2160_v38 = vmul.f32 %v3539_v14, %v3459_v17  ;;  %v2869_v17 = vld [vmem:[%s3590_s26 + $0xa8] sm:$0xf]  ;;  %v3160_v14 = vld [vmem:[%s3590_s26 + $0xb0] sm:$0xf0] }
  0xc4   : > { %v961_v63 = vsel %vm958_vm6, %v960_v60, %v956_v62  ;;  %v1392_v7 = vadd.f32 1.0, %v3257_v3  ;;  %v2870_v44 = vor.u32 %v3160_v14, %v2869_v17  ;;  %v2853_v58 = vld [vmem:[%s3590_s26 + $0x78] sm:$0xf]  ;;  %v2857_v60 = vld [vmem:[%s3590_s26 + $0x80] sm:$0xf] }
  0xc5   : > { %v3575_v2 = vmul.f32 %v961_v63, %v3511_v50  ;;  %3258 = vrcp.f32 %v1391_v4  ;;  %vm1400_vm7 = vweird.f32 %v1391_v4  ;;  %v1406_v19 = vand.u32 2147483648, %v1391_v4  ;;  %1295 = vmatpush.bf16.msra.mxu3 %v2866_v57  ;;  %v3157_v63 = vld [vmem:[%s3590_s26 + $0x88] sm:$0xf0] }
  0xc6   : > { %3260 = vrcp.f32 %v1392_v7  ;;  %v1404_v20 = vand.u32 2147483647, %v1391_v4  ;;  %v1421_v50 = vand.u32 2147483648, %v1392_v7  ;;  %vm1415_vm9 = vweird.f32 %v1392_v7  ;;  %1280 = vmatpush.bf16.msra.mxu2 %v2870_v44 }
  0xc7   : > { %v1022_v8 = vpack.c.bf16 %v3575_v2, %v3572_v1  ;;  %v1419_v22 = vand.u32 2147483647, %v1392_v7  ;;  %v1407_v24 = vor.u32 1.1754944e-38, %v1406_v19  ;;  %v2164_v39 = vsel %vm1310_vm0, %v2160_v38, 0.0  ;;  %v2849_v19 = vld [vmem:[%s3590_s26 + $0x68] sm:$0xf] }
  0xc8   : > { %vm1405_vm12 = vcmp.eq.f32.partialorder %v1404_v20, 8.507059e+37  ;;  %v1422_v27 = vor.u32 1.1754944e-38, %v1421_v50  ;;  %3262 = vpow2.f32 %v3092_v42  ;;  %v2854_v62 = vor.u32 %v3156_v59, %v2853_v58  ;;  %v2833_v38 = vld [vmem:[%s3590_s26 + $0x38] sm:$0xf] }
  0xc9   : > { %1099 = vmatmul.bf16.vlgmr.msra.gmra.mxu1 %v1022_v8  ;;  %vm1420_vm14 = vcmp.eq.f32.partialorder %v1419_v22, 8.507059e+37  ;;  %v2858_v3 = vor.u32 %v3157_v63, %v2857_v60  ;;  %v3152_v22 = vld [vmem:[%s3590_s26 + $0x50] sm:$0xf0] }
  0xca   : > { %1281 = vmatpush.bf16.msra.mxu2 %v2862_v54 }
  0xcb   : > { %v3259_v11 = vpop.eup %3258  ;;  %1296 = vmatpush.bf16.msra.mxu3 %v2858_v3  ;;  %v2813_v3 = vld [vmem:[%s3590_s26] sm:$0xf] }
  0xcc   : > { %v3261_v13 = vpop.eup %3260  ;;  %v1396_v15 = vmul.f32 %v3259_v11, %v1391_v4  ;;  %vm1401_vm8 = vweird.f32 %v3259_v11 }
  0xcd   : > { %v1411_v16 = vmul.f32 %v3261_v13, %v1392_v7  ;;  %vm1416_vm10 = vweird.f32 %v3261_v13  ;;  %vm1402_vm11 = vmor %vm1400_vm7, %vm1401_vm8 }
  0xce   : > { %v1397_v37 = vsub.f32 1.0, %v1396_v15  ;;  %vm1417_vm13 = vmor %vm1415_vm9, %vm1416_vm10  ;;  %v3263_v18 = vpop.eup %3262  ;;  %1282 = vmatpush.bf16.msra.mxu2 %v2854_v62 }
  0xcf   : > { %v1412_v21 = vsub.f32 1.0, %v1411_v16  ;;  %v3596_v51 = vadd.f32 1.0, %v3263_v18  ;;  %v2825_v18 = vld [vmem:[%s3590_s26 + $0x20] sm:$0xf] }
  0xd0   : > { %v1398_v23 = vmul.f32 %v3259_v11, %v1397_v37  ;;  %v3155_v37 = vld [vmem:[%s3590_s26 + $0x70] sm:$0xf0] }
  0xd1   : > { %v1413_v25 = vmul.f32 %v3261_v13, %v1412_v21  ;;  %v2850_v20 = vor.u32 %v3155_v37, %v2849_v19  ;;  %v2837_v21 = vld [vmem:[%s3590_s26 + $0x48] sm:$0xf]  ;;  %vm2242_vm15 = vweird.f32 %v3596_v51 }
  0xd2   : > { %v1399_v26 = vadd.f32 %v3259_v11, %v1398_v23  ;;  %v2841_v23 = vld [vmem:[%s3590_s26 + $0x50] sm:$0xf] }
  0xd3   : > { %v1414_v28 = vadd.f32 %v3261_v13, %v1413_v25  ;;  %1297 = vmatpush.bf16.msra.mxu3 %v2850_v20  ;;  %v3153_v25 = vld [vmem:[%s3590_s26 + $0x58] sm:$0xf0] }
  0xd4   : > { %v1403_v29 = vsel %vm1402_vm11, %v3259_v11, %v1399_v26  ;;  %v2845_v11 = vld [vmem:[%s3590_s26 + $0x60] sm:$0xf] }
  0xd5   : > { %v1408_v30 = vsel %vm1405_vm12, %v1407_v24, %v1403_v29  ;;  %v1418_v31 = vsel %vm1417_vm13, %v3261_v13, %v1414_v28  ;;  %v3154_v13 = vld [vmem:[%s3590_s26 + $0x68] sm:$0xf0]  ;;  %v2838_v24 = vor.u32 %v3152_v22, %v2837_v21  ;;  %v2842_v29 = vor.u32 %v3153_v25, %v2841_v23 }
  0xd6   : > { %v2883_v32 = vadd.f32 -1.0, %v1408_v30  ;;  %v1423_v33 = vsel %vm1420_vm14, %v1422_v27, %v1418_v31  ;;  %v2846_v16 = vor.u32 %v3154_v13, %v2845_v11  ;;  %v2248_v27 = vand.u32 2147483648, %v3596_v51  ;;  %v3235_v31 = vld [vmem:[%s822_s21] ss:$0 sm:$0xff]  ;;  %s3677_s21 = smul.u32 3, %s3996_s22 }
  0xd7   : > { %v2884_v10 = vadd.f32 -1.0, %v1423_v33  ;;  %v2246_v30 = vand.u32 2147483647, %v3596_v51  ;;  %1298 = vmatpush.bf16.msra.mxu3 %v2842_v29 }
  0xd8   : > { %v1462_v6 = vmul.f32 %v3530_v9, %v2883_v32  ;;  %1283 = vmatpush.bf16.msra.mxu2 %v2846_v16  ;;  %s831_s23 = scalar_lea.vmem %s3966_s12, %s3677_s21  ;;  %s858_s0 = scalar_lea.vmem %s3973_s19, %s3677_s21 }
  0xd9   : > { %v1463_v35 = vmul.f32 %v3530_v9, %v2884_v10  ;;  %v2249_v10 = vor.u32 1.1754944e-38, %v2248_v27  ;;  %vm2247_vm3 = vcmp.eq.f32.partialorder %v2246_v30, 8.507059e+37 }
  0xda   : > { %v1466_v34 = vadd.f32 1.0, %v1462_v6 }
  0xdb   : > { %v1467_v36 = vadd.f32 1.0, %v1463_v35  ;;  %v2829_v35 = vld [vmem:[%s3590_s26 + $0x30] sm:$0xf] }
  0xdc   : > { %1472 = vperm.xlu2 %3229, %v1466_v34   ;;  %1284 = vmatpush.bf16.msra.mxu2 %v2838_v24 }
  0xe4   : > { %1477 = vperm.xlu2 %3229, %v1467_v36   ;;  %v3150_v36 = vld [vmem:[%s3590_s26 + $0x38] sm:$0xf0] }
  0xe5   : > { %v2830_v40 = vor.u32 %v3150_v36, %v2829_v35 }
  0xe7   : > { %1285 = vmatpush.bf16.msra.mxu2 %v2830_v40 }
 0x106   : > { %v3668_v40 = vpop.permute.xlu2 %1482 }
 0x10d   : > { %2165 = vadd.xlane.f32.xlu2 %v2164_v39 }
 0x110   : > { %v2172_v41 = vpop.xlane.xlu0 %2171 }
 0x111   : > { %v3091_v0 = vmul.f32 -1.442695, %v2172_v41  ;;  %v3151_v41 = vld [vmem:[%s3590_s26 + $0x40] sm:$0xf0] }
 0x112   : > { %v2834_v17 = vor.u32 %v3151_v41, %v2833_v38 }
 0x114   : > { %1299 = vmatpush.bf16.msra.mxu3 %v2834_v17 }
 0x11f   : > { %v2169_v46 = vpop.xlane.xlu0 %2168 }
 0x120   : > { %v3090_v49 = vmul.f32 -1.442695, %v2169_v46  ;;  %v2821_v46 = vld [vmem:[%s3590_s26 + $0x18] sm:$0xf] }
 0x122   : > { %3264 = vpow2.f32 %v3090_v49  ;;  %v2822_v49 = vor.u32 %v3148_v47, %v2821_v46 }
 0x123   : > { %3266 = vrcp.f32 %v3596_v51 }
 0x124   : > { %3268 = vpow2.f32 %v3091_v0  ;;  %1286 = vmatpush.bf16.msra.mxu2 %v2822_v49 }
 0x128   : > { %v3265_v4 = vpop.eup %3264 }
 0x129   : > { %v3267_v7 = vpop.eup %3266  ;;  %v3607_v8 = vadd.f32 1.0, %v3265_v4  ;;  %v3146_v4 = vld [vmem:[%s3590_s26 + $0x8] sm:$0xf0] }
 0x12a   : > { %v2238_v15 = vmul.f32 %v3267_v7, %v3596_v51  ;;  %v3269_v28 = vpop.eup %3268  ;;  %vm2243_vm1 = vweird.f32 %v3267_v7  ;;  %v3149_v51 = vld [vmem:[%s3590_s26 + $0x28] sm:$0xf0]  ;;  %v2814_v13 = vor.u32 %v3146_v4, %v2813_v3 }
 0x12b   : > { %3270 = vrcp.f32 %v3607_v8  ;;  %v3627_v32 = vadd.f32 1.0, %v3269_v28  ;;  %vm3629_vm2 = vmor %vm2242_vm15, %vm2243_vm1  ;;  %v2218_v54 = vand.u32 2147483648, %v3607_v8  ;;  %v2826_v56 = vor.u32 %v3149_v51, %v2825_v18  ;;  %v3670_v18 = vpop.permute.xlu2 %1487 }
 0x12c   : > { %v2239_v50 = vsub.f32 1.0, %v2238_v15  ;;  %vm2212_vm4 = vweird.f32 %v3607_v8  ;;  %v2216_v62 = vand.u32 2147483647, %v3607_v8  ;;  %v3147_v15 = vld [vmem:[%s3590_s26 + $0x10] sm:$0xf0]  ;;  %1287 = vmatpush.bf16.msra.mxu2 %v2814_v13 }
 0x12d   : > { %3272 = vrcp.f32 %v3627_v32  ;;  %v2219_v63 = vor.u32 1.1754944e-38, %v2218_v54  ;;  %1300 = vmatpush.bf16.msra.mxu3 %v2826_v56  ;;  %v2233_v24 = vand.u32 2147483648, %v3627_v32  ;;  %vm2227_vm8 = vweird.f32 %v3627_v32 }
 0x12e   : > { %v2240_v26 = vmul.f32 %v3267_v7, %v2239_v50  ;;  %vm2217_vm7 = vcmp.eq.f32.partialorder %v2216_v62, 8.507059e+37  ;;  %v2231_v30 = vand.u32 2147483647, %v3627_v32 }
 0x130   : > { %v2241_v33 = vadd.f32 %v3267_v7, %v2240_v26  ;;  %vm2232_vm11 = vcmp.eq.f32.partialorder %v2231_v30, 8.507059e+37 }
 0x131   : > { %v3271_v34 = vpop.eup %3270 }
 0x132   : > { %v2208_v39 = vmul.f32 %v3271_v34, %v3607_v8  ;;  %v2245_v42 = vsel %vm3629_vm2, %v3267_v7, %v2241_v33  ;;  %vm2213_vm5 = vweird.f32 %v3271_v34  ;;  %v2817_v7 = vld [vmem:[%s3590_s26 + $0x8] sm:$0xf]  ;;  %v2234_v33 = vor.u32 1.1754944e-38, %v2233_v24 }
 0x133   : > { %v2250_v44 = vsel %vm2247_vm3, %v2249_v10, %v2245_v42  ;;  %v3273_v57 = vpop.eup %3272  ;;  %vm3651_vm6 = vmor %vm2212_vm4, %vm2213_vm5  ;;  %v2818_v37 = vor.u32 %v3147_v15, %v2817_v7 }
 0x134   : > { %v2209_v43 = vsub.f32 1.0, %v2208_v39  ;;  %v3096_v52 = vadd.f32 -1.0, %v2250_v44  ;;  %v2223_v0 = vmul.f32 %v3273_v57, %v3627_v32  ;;  %vm2228_vm9 = vweird.f32 %v3273_v57 }
 0x135   : > { %1301 = vmatpush.bf16.msra.mxu3 %v2818_v37  ;;  %vm2229_vm10 = vmor %vm2227_vm8, %vm2228_vm9 }
 0x136   : > { %v2210_v53 = vmul.f32 %v3271_v34, %v2209_v43  ;;  %v2259_v58 = vmul.f32 %v3530_v9, %v3096_v52  ;;  %v2224_v19 = vsub.f32 1.0, %v2223_v0  ;;  %v1473_v0 = vpop.permute.xlu2 %1472 }
 0x138   : > { %v2211_v59 = vadd.f32 %v3271_v34, %v2210_v53  ;;  %v2263_v11 = vadd.f32 1.0, %v2259_v58  ;;  %v2225_v22 = vmul.f32 %v3273_v57, %v2224_v19 }
 0x13a   : > { %v2215_v16 = vsel %vm3651_vm6, %v3271_v34, %v2211_v59  ;;  %2281 = vperm.xlu0 %3227, %v2263_v11   ;;  %v2226_v27 = vadd.f32 %v3273_v57, %v2225_v22 }
 0x13b   : > { %v2220_v20 = vsel %vm2217_vm7, %v2219_v63, %v2215_v16 }
 0x13c   : > { %v3094_v8 = vadd.f32 -1.0, %v2220_v20 }
 0x13e   : > { %v2257_v23 = vmul.f32 %v3530_v9, %v3094_v8  ;;  %v3673_v3 = vpop.permute.xlu2 %1477 }
 0x140   : > { %v2261_v29 = vadd.f32 1.0, %v2257_v23 }
 0x142   : > { %2271 = vperm.xlu0 %3227, %v2261_v29  }
 0x146   : > { %v1100_v14 = vpop.f32.mrf.mxu1 }
 0x147   : > { %v3641_v45 = vadd.f32 %v3235_v31, %v1100_v14 }
 0x149   : > { %v2809_v55 = vmul.f32 -1.442695, %v3641_v45 }
 0x14b   : > { %3274 = vpow2.f32 %v2809_v55 }
 0x14e   : > { %v1102_v50 = vpop.f32.mrf.mxu1 }
 0x14f   : > { %v1103_v21 = vadd.f32 %v3235_v31, %v1102_v50  ;;  %v2230_v31 = vsel %vm2229_vm10, %v3273_v57, %v2226_v27 }
 0x150   : > { %v2235_v6 = vsel %vm2232_vm11, %v2234_v33, %v2230_v31  ;;  %vm1590_vm11 = vcmask 261120  }
 0x151   : > { %v3275_v25 = vpop.eup %3274  ;;  %v2810_v26 = vmul.f32 -1.442695, %v1103_v21  ;;  %v3095_v10 = vadd.f32 -1.0, %v2235_v6 }
 0x152   : > { %v1111_v28 = vadd.f32 1.0, %v3275_v25 }
 0x153   : > { %3276 = vpow2.f32 %v2810_v26  ;;  %v2258_v35 = vmul.f32 %v3530_v9, %v3095_v10 }
 0x154   : > { %3278 = vrcp.f32 %v1111_v28  ;;  %v1124_v44 = vand.u32 2147483648, %v1111_v28  ;;  %vm1118_vm13 = vweird.f32 %v1111_v28  ;;  %v1122_v46 = vand.u32 2147483647, %v1111_v28 }
 0x155   : > { %v2262_v41 = vadd.f32 1.0, %v2258_v35 }
 0x156   : > { %v1125_v54 = vor.u32 1.1754944e-38, %v1124_v44  ;;  %vm1123_vm1 = vcmp.eq.f32.partialorder %v1122_v46, 8.507059e+37 }
 0x157   : > { %2276 = vperm.xlu1 %3228, %v2262_v41   ;;  %v3701_v41 = vld [vmem:[%s3695_s29 + $0x8] sm:$0xff] }
 0x159   : > { %v3277_v34 = vpop.eup %3276 }
 0x15a   : > { %v3279_v36 = vpop.eup %3278  ;;  %v1112_v38 = vadd.f32 1.0, %v3277_v34 }
 0x15b   : > { %v1114_v39 = vmul.f32 %v3279_v36, %v1111_v28  ;;  %vm1119_vm12 = vweird.f32 %v3279_v36  ;;  %v1178_v28 = vld [vmem:[%s831_s23] sm:$0x7]  ;;  %s3728_s23 = scalar_lea.vmem %s3968_s14, %s3131_s24 }
 0x15c   : > { %3280 = vrcp.f32 %v1112_v38  ;;  %vm1120_vm14 = vmor %vm1118_vm13, %vm1119_vm12  ;;  %v1139_v49 = vand.u32 2147483648, %v1112_v38  ;;  %v1137_v53 = vand.u32 2147483647, %v1112_v38  ;;  %vm1133_vm2 = vweird.f32 %v1112_v38 }
 0x15d   : > { %v1115_v42 = vsub.f32 1.0, %v1114_v39  ;;  %v1180_v29 = vperm.slane %v1178_v28, 0  ;;  %v1181_v30 = vperm.slane %v1178_v28, 2  ;;  %v3698_v39 = vld [vmem:[%s3695_s29] sm:$0xff]  ;;  %v3748_v28 = vld [vmem:[%s3695_s29 + $0x48] sm:$0xff] }
 0x15e   : > { %v1140_v57 = vor.u32 1.1754944e-38, %v1139_v49  ;;  %vm1138_vm4 = vcmp.eq.f32.partialorder %v1137_v53, 8.507059e+37 }
 0x15f   : > { %v1116_v32 = vmul.f32 %v3279_v36, %v1115_v42  ;;  %v3704_v42 = vld [vmem:[%s3695_s29 + $0x10] sm:$0xff] }
 0x161   : > { %v1117_v14 = vadd.f32 %v3279_v36, %v1116_v32 }
 0x162   : > { %v3281_v17 = vpop.eup %3280 }
 0x163   : > { %v1129_v43 = vmul.f32 %v3281_v17, %v1112_v38  ;;  %v1121_v51 = vsel %vm1120_vm14, %v3279_v36, %v1117_v14  ;;  %vm1134_vm15 = vweird.f32 %v3281_v17 }
 0x164   : > { %v1126_v56 = vsel %vm1123_vm1, %v1125_v54, %v1121_v51  ;;  %vm1135_vm3 = vmor %vm1133_vm2, %vm1134_vm15  ;;  %v3710_v54 = vld [vmem:[%s3695_s29 + $0x18] sm:$0xff] }
 0x165   : > { %v1130_v47 = vsub.f32 1.0, %v1129_v43  ;;  %v1143_v60 = vmul.f32 %v1126_v56, %v3641_v45  ;;  %v3716_v56 = vld [vmem:[%s3695_s29 + $0x28] sm:$0xff] }
 0x167   : > { %v1131_v52 = vmul.f32 %v3281_v17, %v1130_v47 }
 0x169   : > { %v1132_v55 = vadd.f32 %v3281_v17, %v1131_v52 }
 0x16b   : > { %v1136_v58 = vsel %vm1135_vm3, %v3281_v17, %v1132_v55  ;;  %v3713_v55 = vld [vmem:[%s3695_s29 + $0x20] sm:$0xff] }
 0x16c   : > { %v1141_v59 = vsel %vm1138_vm4, %v1140_v57, %v1136_v58 }
 0x16d   : > { %v1144_v62 = vmul.f32 %v1141_v59, %v1103_v21 }
 0x16f   : > { %v1145_v63 = vpack.c.bf16 %v1144_v62, %v1143_v60 }
 0x171   : > { %1288 = vmatmul.bf16.vlgmr.msra.gmra.mxu2 %v1145_v63  ;;  %1302 = vmatmul.bf16.vlgmr.msra.gmra.mxu3 %v1145_v63 }
 0x180   : > { %v2166_v4 = vpop.xlane.xlu2 %2165 }
 0x181   : > { %v3089_v7 = vmul.f32 -1.442695, %v2166_v4 }
 0x183   : > { %3282 = vpow2.f32 %v3089_v7 }
 0x189   : > { %v3283_v11 = vpop.eup %3282 }
 0x18a   : > { %v2188_v13 = vadd.f32 1.0, %v3283_v11 }
 0x18c   : > { %3284 = vrcp.f32 %v2188_v13  ;;  %v2203_v19 = vand.u32 2147483648, %v2188_v13  ;;  %vm2197_vm5 = vweird.f32 %v2188_v13  ;;  %v2201_v45 = vand.u32 2147483647, %v2188_v13 }
 0x18e   : > { %v2204_v50 = vor.u32 1.1754944e-38, %v2203_v19  ;;  %vm2202_vm8 = vcmp.eq.f32.partialorder %v2201_v45, 8.507059e+37 }
 0x192   : > { %v3285_v15 = vpop.eup %3284 }
 0x193   : > { %v2193_v16 = vmul.f32 %v3285_v15, %v2188_v13  ;;  %vm2198_vm6 = vweird.f32 %v3285_v15 }
 0x194   : > { %vm2199_vm7 = vmor %vm2197_vm5, %vm2198_vm6  ;;  %vm2514_vm6 = vcmask 1041408  }
 0x195   : > { %v2194_v37 = vsub.f32 1.0, %v2193_v16  ;;  %v3737_v16 = vld [vmem:[%s3695_s29 + $0x40] sm:$0xff] }
 0x197   : > { %v2195_v20 = vmul.f32 %v3285_v15, %v2194_v37  ;;  %v3177_v37 = vld [vmem:[%s3728_s23 + $0x38] sm:$0xff] }
 0x199   : > { %v2196_v8 = vadd.f32 %v3285_v15, %v2195_v20 }
 0x19b   : > { %v2200_v21 = vsel %vm2199_vm7, %v3285_v15, %v2196_v8  ;;  %v3734_v15 = vld [vmem:[%s3695_s29 + $0x38] sm:$0xff]  ;;  %vm2526_vm7 = vcmask 15360  }
 0x19c   : > { %v2205_v22 = vsel %vm2202_vm8, %v2204_v50, %v2200_v21  ;;  %v3176_v50 = vld [vmem:[%s3728_s23 + $0x30] sm:$0xff]  ;;  %vm2528_vm8 = vcmask 17408  }
 0x19d   : > { %v3093_v23 = vadd.f32 -1.0, %v2205_v22 }
 0x19f   : > { %v2256_v24 = vmul.f32 %v3530_v9, %v3093_v23 }
 0x1a1   : > { %v2260_v25 = vadd.f32 1.0, %v2256_v24 }
 0x1a3   : > { %2266 = vperm.xlu1 %3228, %v2260_v25  }
 0x1f4   : > { %v1289_v26 = vpop.f32.mrf.mxu2  ;;  %v1303_v27 = vpop.f32.mrf.mxu3 }
 0x1f5   : > { %v1290_v6 = vadd.f32 %v1289_v26, %v1180_v29  ;;  %v1304_v10 = vadd.f32 %v1303_v27, %v1181_v30  ;;  %v3175_v27 = vld [vmem:[%s3728_s23 + $0x28] sm:$0xff] }
 0x1fc   : > { %v1291_v33 = vpop.f32.mrf.mxu2  ;;  %v1305_v31 = vpop.f32.mrf.mxu3 }
 0x1fd   : > { %v1292_v9 = vadd.f32 %v1291_v33, %v1180_v29  ;;  %v1306_v34 = vadd.f32 %v1305_v31, %v1181_v30  ;;  %v3751_v29 = vld [vmem:[%s3695_s29 + $0x50] sm:$0xff]  ;;  %v3754_v30 = vld [vmem:[%s3695_s29 + $0x58] sm:$0xff] }
 0x1ff   : > { %v1308_v35 = vpack.c.bf16 %v1292_v9, %v1290_v6  ;;  %v1309_v36 = vpack.c.bf16 %v1306_v34, %v1304_v10  ;;  %v3174_v10 = vld [vmem:[%s3728_s23 + $0x20] sm:$0xff] }
 0x201   : > { %1324 = vmatpush.bf16.msrb.mxu0 %v1308_v35  ;;  %1343 = vmatpush.bf16.msrb.mxu1 %v1309_v36 }
 0x204   : > { %2875 = vmatmul.msk.bf16.vlgmr.msrb.gmra.mxu0 %vm1310_vm0, %v3522_v5  ;;  %2877 = vmatmul.msk.bf16.vlgmr.msrb.gmra.mxu1 %vm1310_vm0, %v3522_v5 }
 0x205   : > { %1721 = vmatpush.bf16.msra.mxu1 %v3177_v37 }
 0x209   : > { %1722 = vmatpush.bf16.msra.mxu1 %v3176_v50 }
 0x20d   : > { %1723 = vmatpush.bf16.msra.mxu1 %v3175_v27 }
 0x211   : > { %1724 = vmatpush.bf16.msra.mxu1 %v3174_v10  ;;  %v3199_v10 = vld [vmem:[%s3799_s4 + $0xac] sm:$0xf] }
 0x214   : > { %2876 = vmatmul.msk.bf16.gmra.mxu0 %vm1310_vm0, %v3532_v12  ;;  %2878 = vmatmul.msk.bf16.gmra.mxu1 %vm1310_vm0, %v3532_v12 }
 0x281   : > { %v1326_v38 = vpop.f32.mrf.mxu0  ;;  %v1345_v32 = vpop.f32.mrf.mxu1 }
 0x282   : > { %v1490_v17 = vmul.f32 %v1473_v0, %v1326_v38  ;;  %v1491_v14 = vmul.f32 %v1473_v0, %v1345_v32  ;;  %v3763_v38 = vshrl.u32 %v965_v48, 7 }
 0x284   : > { %v1498_v43 = vpack.c.bf16 %v1490_v17, %v1490_v17  ;;  %v1506_v44 = vmul.f32 %v1491_v14, %v3698_v39  ;;  %v1518_v46 = vmul.f32 %v1491_v14, %v3701_v41  ;;  %v1530_v47 = vmul.f32 %v1491_v14, %v3704_v42 }
 0x286   : > { %1502 = vst [vmem:[#allocation3] sm:$0xf] %v1498_v43  ;;  %v1510_v49 = vpack.c.bf16 %v1506_v44, %v1506_v44  ;;  %v1522_v51 = vpack.c.bf16 %v1518_v46, %v1518_v46  ;;  %v1534_v52 = vpack.c.bf16 %v1530_v47, %v1530_v47  ;;  %v3173_v43 = vld [vmem:[%s3728_s23 + $0x18] sm:$0xff]  ;;  %v3232_v44 = vld [vmem:[%s806_s28] ss:$0 sm:$0xff]  ;;  %s851_s28 = scalar_lea.vmem %s3971_s17, %s3677_s21  ;;  %s2747_s21 = sshll.u32 %s3996_s22, 1 }
 0x287   : > { %1725 = vmatpush.bf16.msra.mxu1 %v3173_v43  ;;  %vm1002_vm9 = vcmp.eq.s32.totalorder %v3763_v38, %v3232_v44  ;;  %v3197_v43 = vld [vmem:[%s3799_s4 + $0x98] sm:$0xf0]  ;;  %s862_s25 = scalar_lea.vmem %s3974_s20, %s2747_s21 }
 0x288   : > { %1514 = vst [vmem:[#allocation3 + $0x4] sm:$0xf] %v1510_v49 }
 0x289   : > { %1526 = vst [vmem:[#allocation3 + $0x8] sm:$0xf] %v1522_v51  ;;  %v1328_v53 = vpop.f32.mrf.mxu0  ;;  %v1347_v57 = vpop.f32.mrf.mxu1 }
 0x28a   : > { %1538 = vst [vmem:[#allocation3 + $0xc] sm:$0xf] %v1534_v52  ;;  %v1492_v58 = vmul.f32 %v3673_v3, %v1328_v53  ;;  %v1493_v59 = vmul.f32 %v3673_v3, %v1347_v57  ;;  %v3731_v3 = vld [vmem:[%s3695_s29 + $0x30] sm:$0xff]  ;;  %v2775_v53 = vsel %vm1002_vm9, 1.0, %v3303_v61  ;;  %s3994_s29 = sld [smem:[#allocation7_spill]] }
 0x28c   : > { %v1499_v60 = vpack.c.bf16 %v1492_v58, %v1492_v58  ;;  %v1507_v62 = vmul.f32 %v1493_v59, %v3710_v54  ;;  %v1519_v63 = vmul.f32 %v1493_v59, %v3713_v55  ;;  %v1531_v0 = vmul.f32 %v1493_v59, %v3716_v56 }
 0x28e   : > { %1503 = vst [vmem:[#allocation3 + $0x10] sm:$0xf] %v1499_v60  ;;  %v1511_v4 = vpack.c.bf16 %v1507_v62, %v1507_v62  ;;  %v1523_v7 = vpack.c.bf16 %v1519_v63, %v1519_v63  ;;  %v1535_v11 = vpack.c.bf16 %v1531_v0, %v1531_v0  ;;  %v2889_v63 = vld [vmem:[#allocation3] sm:$0xf] }
 0x290   : > { %1515 = vst [vmem:[#allocation3 + $0x14] sm:$0xf] %v1511_v4  ;;  %v2897_v50 = vld [vmem:[#allocation3 + $0x8] sm:$0xf] }
 0x291   : > { %1527 = vst [vmem:[#allocation3 + $0x18] sm:$0xf] %v1523_v7  ;;  %v1331_v13 = vpop.f32.mrf.mxu0  ;;  %v1350_v19 = vpop.f32.mrf.mxu1 }
 0x292   : > { %1539 = vst [vmem:[#allocation3 + $0x1c] sm:$0xf] %v1535_v11  ;;  %v1494_v45 = vmul.f32 %v3668_v40, %v1331_v13  ;;  %v1495_v20 = vmul.f32 %v3668_v40, %v1350_v19 }
 0x294   : > { %v1500_v8 = vpack.c.bf16 %v1494_v45, %v1494_v45  ;;  %v1508_v21 = vmul.f32 %v1495_v20, %v3731_v3  ;;  %v1520_v22 = vmul.f32 %v1495_v20, %v3734_v15  ;;  %v1532_v23 = vmul.f32 %v1495_v20, %v3737_v16  ;;  %v3162_v45 = vld [vmem:[#allocation3 + $0x4] sm:$0xf] }
 0x295   : > { %v3164_v52 = vld [vmem:[#allocation3 + $0xc] sm:$0xf0] }
 0x296   : > { %1504 = vst [vmem:[#allocation3 + $0x20] sm:$0xf] %v1500_v8  ;;  %v1512_v24 = vpack.c.bf16 %v1508_v21, %v1508_v21  ;;  %v1524_v25 = vpack.c.bf16 %v1520_v22, %v1520_v22  ;;  %v1536_v26 = vpack.c.bf16 %v1532_v23, %v1532_v23  ;;  %v2890_v7 = vor.u32 %v3164_v52, %v2889_v63  ;;  %v3163_v22 = vld [vmem:[#allocation3 + $0xc] sm:$0xf]  ;;  %v3019_v52 = vld [vmem:[%s3799_s4 + $0x78] sm:$0xf] }
 0x297   : > { %v2891_v4 = vld [vmem:[#allocation3 + $0x10] sm:$0xf0] }
 0x298   : > { %1516 = vst [vmem:[#allocation3 + $0x24] sm:$0xf] %v1512_v24  ;;  %v3165_v13 = vld [vmem:[#allocation3 + $0x14] sm:$0xf0]  ;;  %v2894_v20 = vor.u32 %v3162_v45, %v2891_v4  ;;  %v3172_v24 = vld [vmem:[%s3728_s23 + $0x10] sm:$0xff] }
 0x299   : > { %1528 = vst [vmem:[#allocation3 + $0x28] sm:$0xf] %v1524_v25  ;;  %v1333_v40 = vpop.f32.mrf.mxu0  ;;  %v1352_v33 = vpop.f32.mrf.mxu1  ;;  %v2899_v8 = vld [vmem:[#allocation3 + $0x18] sm:$0xf0]  ;;  %v2898_v21 = vor.u32 %v3165_v13, %v2897_v50  ;;  %1726 = vmatpush.bf16.msra.mxu1 %v3172_v24  ;;  %v3007_v4 = vld [vmem:[%s3799_s4 + $0x60] sm:$0xf] }
 0x29a   : > { %1540 = vst [vmem:[#allocation3 + $0x2c] sm:$0xf] %v1536_v26  ;;  %v1496_v31 = vmul.f32 %v3670_v18, %v1333_v40  ;;  %v1497_v6 = vmul.f32 %v3670_v18, %v1352_v33  ;;  %v999_v18 = vadd.s32 8, %v3763_v38  ;;  %v2902_v23 = vor.u32 %v3163_v22, %v2899_v8  ;;  %v3171_v25 = vld [vmem:[%s3728_s23 + $0x8] sm:$0xff]  ;;  %v3170_v26 = vld [vmem:[%s3728_s23] sm:$0xff] }
 0x29b   : > { %v3015_v45 = vld [vmem:[%s3799_s4 + $0x68] sm:$0xf]  ;;  %v3188_v22 = vld [vmem:[%s3799_s4 + $0x50] sm:$0xf0] }
 0x29c   : > { %v1501_v9 = vpack.c.bf16 %v1496_v31, %v1496_v31  ;;  %v1509_v34 = vmul.f32 %v1497_v6, %v3748_v28  ;;  %v1521_v35 = vmul.f32 %v1497_v6, %v3751_v29  ;;  %v1533_v36 = vmul.f32 %v1497_v6, %v3754_v30 }
 0x29d   : > { %vm1003_vm10 = vcmp.eq.s32.totalorder %v999_v18, %v3232_v44  ;;  %v2905_v48 = vld [vmem:[#allocation3 + $0x20] sm:$0xf]  ;;  %1727 = vmatpush.bf16.msra.mxu1 %v3171_v25  ;;  %v3196_v18 = vld [vmem:[%s3799_s4 + $0x94] sm:$0xf]  ;;  %v2997_v25 = vld [vmem:[%s3799_s4 + $0x54] sm:$0xf0] }
 0x29e   : > { %1505 = vst [vmem:[#allocation3 + $0x30] sm:$0xf] %v1501_v9  ;;  %v1513_v32 = vpack.c.bf16 %v1509_v34, %v1509_v34  ;;  %v1525_v17 = vpack.c.bf16 %v1521_v35, %v1521_v35  ;;  %v1537_v14 = vpack.c.bf16 %v1533_v36, %v1533_v36  ;;  %v2776_v57 = vsel %vm1003_vm10, 1.0, %v3303_v61  ;;  %v3045_v34 = vld [vmem:[%s3799_s4 + $0xb4] sm:$0xf0] }
 0x29f   : > { %v3166_v49 = vld [vmem:[#allocation3 + $0x24] sm:$0xf]  ;;  %v3775_v19 = vpack.c.bf16 %v2776_v57, %v2775_v53  ;;  %v3051_v35 = vld [vmem:[%s3799_s4 + $0xb0] sm:$0xf]  ;;  %v3201_v36 = vld [vmem:[%s3799_s4 + $0xb8] sm:$0xf0] }
 0x2a0   : > { %1517 = vst [vmem:[#allocation3 + $0x34] sm:$0xf] %v1513_v32  ;;  %v2913_v59 = vld [vmem:[#allocation3 + $0x28] sm:$0xf]  ;;  %v3048_v32 = vor.u32 %v3199_v10, %v3045_v34  ;;  %v3194_v53 = vld [vmem:[%s3799_s4 + $0x80] sm:$0xf0] }
 0x2a1   : > { %1529 = vst [vmem:[#allocation3 + $0x38] sm:$0xf] %v1525_v17  ;;  %v3167_v11 = vld [vmem:[#allocation3 + $0x2c] sm:$0xf]  ;;  %1728 = vmatpush.bf16.msra.mxu1 %v3170_v26  ;;  %v3052_v17 = vor.u32 %v3201_v36, %v3051_v35  ;;  %v3003_v26 = vld [vmem:[%s3799_s4 + $0x50] sm:$0xf] }
 0x2a2   : > { %1541 = vst [vmem:[#allocation3 + $0x3c] sm:$0xf] %v1537_v14  ;;  %v3031_v14 = vld [vmem:[%s3799_s4 + $0x90] sm:$0xf]  ;;  %v3193_v57 = vld [vmem:[%s3799_s4 + $0x7c] sm:$0xf] }
 0x2a3   : > { %v3032_v44 = vor.u32 %v3197_v43, %v3031_v14  ;;  %v2985_v34 = vld [vmem:[%s3799_s4 + $0x3c] sm:$0xf0]  ;;  %v2991_v35 = vld [vmem:[%s3799_s4 + $0x38] sm:$0xf]  ;;  %v3186_v36 = vld [vmem:[%s3799_s4 + $0x40] sm:$0xf0] }
 0x2a4   : > { %v2992_v14 = vor.u32 %v3186_v36, %v2991_v35 }
 0x2a5   : > { %v3168_v46 = vld [vmem:[#allocation3 + $0x2c] sm:$0xf0] }
 0x2a6   : > { %v2906_v47 = vor.u32 %v3168_v46, %v2905_v48  ;;  %v3033_v48 = vld [vmem:[%s3799_s4 + $0x9c] sm:$0xf0]  ;;  %v3039_v46 = vld [vmem:[%s3799_s4 + $0x98] sm:$0xf] }
 0x2a7   : > { %v2907_v51 = vld [vmem:[#allocation3 + $0x30] sm:$0xf0] }
 0x2a8   : > { %1600 = vmatpush.bf16.msrb.mxu2 %v2906_v47  ;;  %v2910_v58 = vor.u32 %v3166_v49, %v2907_v51  ;;  %v3169_v60 = vld [vmem:[#allocation3 + $0x34] sm:$0xf0]  ;;  %v3198_v47 = vld [vmem:[%s3799_s4 + $0xa0] sm:$0xf0]  ;;  %v3036_v49 = vor.u32 %v3196_v18, %v3033_v48  ;;  %v2971_v18 = vld [vmem:[%s3799_s4 + $0x18] sm:$0xf] }
 0x2a9   : > { %v2914_v62 = vor.u32 %v3169_v60, %v2913_v59  ;;  %v2915_v0 = vld [vmem:[#allocation3 + $0x38] sm:$0xf0]  ;;  %v3040_v51 = vor.u32 %v3198_v47, %v3039_v46  ;;  %v3021_v59 = vld [vmem:[%s3799_s4 + $0x84] sm:$0xf0]  ;;  %v3027_v60 = vld [vmem:[%s3799_s4 + $0x80] sm:$0xf] }
 0x2aa   : > { %1614 = vmatpush.bf16.msrb.mxu3 %v2910_v58  ;;  %v2918_v37 = vor.u32 %v3167_v11, %v2915_v0  ;;  %v3020_v58 = vor.u32 %v3194_v53, %v3019_v52  ;;  %v3024_v63 = vor.u32 %v3193_v57, %v3021_v59  ;;  %v3190_v11 = vld [vmem:[%s3799_s4 + $0x64] sm:$0xf]  ;;  %v3181_v46 = vld [vmem:[%s3799_s4 + $0x1c] sm:$0xf]  ;;  %v2973_v47 = vld [vmem:[%s3799_s4 + $0x24] sm:$0xf0] }
 0x2ab   : > { %1628 = vmatpush.bf16.msra.mxu0 %v2914_v62  ;;  %v3195_v62 = vld [vmem:[%s3799_s4 + $0x88] sm:$0xf0]  ;;  %v2976_v53 = vor.u32 %v3181_v46, %v2973_v47  ;;  %v2959_v59 = vld [vmem:[%s3799_s4] sm:$0xf] }
 0x2ac   : > { %1601 = vmatpush.bf16.msrb.mxu2 %v2890_v7  ;;  %v3028_v0 = vor.u32 %v3195_v62, %v3027_v60  ;;  %v3191_v7 = vld [vmem:[%s3799_s4 + $0x68] sm:$0xf0]  ;;  %v3178_v62 = vld [vmem:[%s3799_s4 + $0x4] sm:$0xf] }
 0x2ad   : > { %v3008_v13 = vor.u32 %v3191_v7, %v3007_v4  ;;  %v3183_v57 = vld [vmem:[%s3799_s4 + $0x28] sm:$0xf0]  ;;  %v2961_v4 = vld [vmem:[%s3799_s4 + $0xc] sm:$0xf0]  ;;  %v2967_v7 = vld [vmem:[%s3799_s4 + $0x8] sm:$0xf] }
 0x2ae   : > { %1615 = vmatpush.bf16.msrb.mxu3 %v2894_v20  ;;  %v3192_v20 = vld [vmem:[%s3799_s4 + $0x70] sm:$0xf0]  ;;  %v3179_v60 = vld [vmem:[%s3799_s4 + $0x8] sm:$0xf0] }
 0x2af   : > { %1629 = vmatpush.bf16.msra.mxu0 %v2898_v21  ;;  %2919 = vmatmul.msk.bf16.vlgmr.msrb.gmra.mxu2 %vm1590_vm11, %v3775_v19  ;;  %v3016_v8 = vor.u32 %v3192_v20, %v3015_v45  ;;  %v2995_v21 = vld [vmem:[%s3799_s4 + $0x48] sm:$0xf]  ;;  %v2964_v45 = vor.u32 %v3178_v62, %v2961_v4 }
 0x2b0   : > { %1642 = vmatpush.bf16.msra.mxu2 %v2918_v37  ;;  %v3009_v37 = vld [vmem:[%s3799_s4 + $0x6c] sm:$0xf0]  ;;  %v2996_v24 = vor.u32 %v3188_v22, %v2995_v21 }
 0x2b1   : > { %2920 = vmatmul.msk.bf16.vlgmr.msrb.gmra.mxu3 %vm1590_vm11, %v3775_v19  ;;  %v3012_v50 = vor.u32 %v3190_v11, %v3009_v37  ;;  %v3180_v11 = vld [vmem:[%s3799_s4 + $0x10] sm:$0xf0] }
 0x2b2   : > { %2921 = vmatmul.msk.bf16.vlgmr.msra.gmra.mxu0 %vm1590_vm11, %v3775_v19  ;;  %v2968_v20 = vor.u32 %v3180_v11, %v2967_v7 }
 0x2b3   : > { %1958 = vmatpush.bf16.msrb.mxu0 %v3048_v32 }
 0x2b4   : > { %1643 = vmatpush.bf16.msra.mxu2 %v2902_v23  ;;  %v3187_v23 = vld [vmem:[%s3799_s4 + $0x4c] sm:$0xf] }
 0x2b7   : > { %1959 = vmatpush.bf16.msrb.mxu0 %v3036_v49  ;;  %v2979_v49 = vld [vmem:[%s3799_s4 + $0x20] sm:$0xf] }
 0x2b8   : > { %1972 = vmatpush.bf16.msrb.mxu2 %v3052_v17 }
 0x2bb   : > { %1960 = vmatpush.bf16.msrb.mxu0 %v3024_v63 }
 0x2bc   : > { %1973 = vmatpush.bf16.msrb.mxu2 %v3040_v51 }
 0x2bf   : > { %2922 = vmatmul.msk.bf16.vlgmr.msra.gmra.mxu2 %vm1590_vm11, %v3775_v19  ;;  %1961 = vmatpush.bf16.msrb.mxu0 %v3012_v50 }
 0x2c0   : > { %1974 = vmatpush.bf16.msrb.mxu2 %v3028_v0  ;;  %v2960_v0 = vor.u32 %v3179_v60, %v2959_v59 }
 0x2c4   : > { %1975 = vmatpush.bf16.msrb.mxu2 %v3016_v8 }
 0x32f   : > { %v3852_v52 = vpop.f32.mrf.mxu0 }
 0x332   : > { %v1603_v27 = vpop.f32.mrf.mxu2 }
 0x333   : > { %v1650_v33 = vadd.f32 %v1603_v27, %v3572_v1  ;;  %v3043_v1 = vld [vmem:[%s3799_s4 + $0xa8] sm:$0xf]  ;;  %v3189_v27 = vld [vmem:[%s3799_s4 + $0x58] sm:$0xf0] }
 0x334   : > { %v3850_v51 = vpop.f32.mrf.mxu3 }
 0x335   : > { %v1994_v37 = vpack.c.bf16 %v3852_v52, %v3850_v51 }
 0x337   : > { %1998 = vst [vmem:[#allocation2 + $0xc] sm:$0xff] %v1994_v37 }
 0x33a   : > { %v1605_v40 = vpop.f32.mrf.mxu2 }
 0x33b   : > { %v1651_v31 = vadd.f32 %v1605_v40, %v3575_v2  ;;  %v3200_v2 = vld [vmem:[%s3799_s4 + $0xb0] sm:$0xf0]  ;;  %v3236_v40 = vld [vmem:[%s842_s27] ss:$0 sm:$0xff] }
 0x33c   : > { %v3044_v9 = vor.u32 %v3200_v2, %v3043_v1  ;;  %v3185_v1 = vld [vmem:[%s3799_s4 + $0x38] sm:$0xf0]  ;;  %v3184_v2 = vld [vmem:[%s3799_s4 + $0x34] sm:$0xf]  ;;  %v3863_v22 = vpop.f32.mrf.mxu3 }
 0x33d   : > { %v1652_v6 = vpack.c.bf16 %v1651_v31, %v1650_v33  ;;  %v3000_v33 = vor.u32 %v3187_v23, %v2997_v25  ;;  %v3004_v31 = vor.u32 %v3189_v27, %v3003_v26  ;;  %v2988_v17 = vor.u32 %v3184_v2, %v2985_v34  ;;  %v3865_v23 = vpop.f32.mrf.mxu0 }
 0x33e   : > { %1944 = vmatpush.bf16.msra.mxu3 %v3044_v9 }
 0x33f   : > { %1729 = vmatmul.bf16.vlgmr.msra.gmra.mxu1 %v1652_v6  ;;  %1962 = vmatpush.bf16.msrb.mxu0 %v3000_v33  ;;  %v2983_v6 = vld [vmem:[%s3799_s4 + $0x30] sm:$0xf]  ;;  %v3203_v33 = vld [vmem:[#allocation2 + $0xc] sm:$0xf] }
 0x340   : > { %1976 = vmatpush.bf16.msrb.mxu2 %v3004_v31  ;;  %v2984_v9 = vor.u32 %v3185_v1, %v2983_v6 }
 0x342   : > { %1945 = vmatpush.bf16.msra.mxu3 %v3032_v44  ;;  %v3182_v44 = vld [vmem:[%s3799_s4 + $0x20] sm:$0xf0]  ;;  %v3870_v62 = vpop.f32.mrf.mxu2 }
 0x343   : > { %1963 = vmatpush.bf16.msrb.mxu0 %v2988_v17  ;;  %v2972_v48 = vor.u32 %v3182_v44, %v2971_v18 }
 0x344   : > { %1977 = vmatpush.bf16.msrb.mxu2 %v2992_v14 }
 0x346   : > { %1946 = vmatpush.bf16.msra.mxu3 %v3020_v58  ;;  %v2980_v58 = vor.u32 %v3183_v57, %v2979_v49 }
 0x347   : > { %1964 = vmatpush.bf16.msrb.mxu0 %v2976_v53 }
 0x348   : > { %1978 = vmatpush.bf16.msrb.mxu2 %v2980_v58 }
 0x34a   : > { %1947 = vmatpush.bf16.msra.mxu3 %v3008_v13 }
 0x34b   : > { %1965 = vmatpush.bf16.msrb.mxu0 %v2964_v45 }
 0x34c   : > { %1979 = vmatpush.bf16.msrb.mxu2 %v2968_v20 }
 0x34e   : > { %1948 = vmatpush.bf16.msra.mxu3 %v2996_v24  ;;  %v1996_v24 = vpack.c.bf16 %v3865_v23, %v3863_v22 }
 0x350   : > { %2000 = vst [vmem:[#allocation2 + $0x24] sm:$0xff] %v1996_v24 }
 0x352   : > { %1949 = vmatpush.bf16.msra.mxu3 %v2984_v9 }
 0x356   : > { %1950 = vmatpush.bf16.msra.mxu3 %v2972_v48 }
 0x357   : > { %v3065_v6 = vld [vmem:[#allocation2 + $0x20] sm:$0xf0] }
 0x358   : > { %v3068_v2 = vor.u32 %v3203_v33, %v3065_v6 }
 0x35a   : > { %1951 = vmatpush.bf16.msra.mxu3 %v2960_v0  ;;  %2102 = vmatpush.bf16.msra.mxu2 %v3068_v2  ;;  %v3874_v0 = vpop.f32.mrf.mxu2 }
 0x35b   : > { %v1997_v4 = vpack.c.bf16 %v3874_v0, %v3874_v0 }
 0x35d   : > { %2001 = vst [vmem:[#allocation2 + $0x2c] sm:$0xf] %v1997_v4 }
 0x3bc   : > { %v1730_v10 = vpop.f32.mrf.mxu1 }
 0x3bd   : > { %v3842_v32 = vadd.f32 %v3236_v40, %v1730_v10 }
 0x3bf   : > { %v2955_v43 = vmul.f32 -1.442695, %v3842_v32 }
 0x3c1   : > { %3286 = vpow2.f32 %v2955_v43 }
 0x3c4   : > { %v1732_v63 = vpop.f32.mrf.mxu1 }
 0x3c5   : > { %v1733_v13 = vadd.f32 %v3236_v40, %v1732_v63  ;;  %v1995_v63 = vpack.c.bf16 %v3870_v62, %v3870_v62 }
 0x3c7   : > { %v3287_v50 = vpop.eup %3286  ;;  %v2956_v8 = vmul.f32 -1.442695, %v1733_v13  ;;  %1999 = vst [vmem:[#allocation2 + $0x14] sm:$0xf] %v1995_v63 }
 0x3c8   : > { %v1741_v21 = vadd.f32 1.0, %v3287_v50 }
 0x3c9   : > { %3288 = vpow2.f32 %v2956_v8 }
 0x3ca   : > { %3290 = vrcp.f32 %v1741_v21  ;;  %v1754_v35 = vand.u32 2147483648, %v1741_v21  ;;  %vm1748_vm13 = vweird.f32 %v1741_v21  ;;  %v1752_v36 = vand.u32 2147483647, %v1741_v21 }
 0x3cc   : > { %v1755_v48 = vor.u32 1.1754944e-38, %v1754_v35  ;;  %vm1753_vm1 = vcmp.eq.f32.partialorder %v1752_v36, 8.507059e+37  ;;  %v3073_v36 = vld [vmem:[#allocation2 + $0x28] sm:$0xf0] }
 0x3ce   : > { %v3204_v35 = vld [vmem:[#allocation2 + $0x14] sm:$0xf] }
 0x3cf   : > { %v3289_v25 = vpop.eup %3288 }
 0x3d0   : > { %v3291_v26 = vpop.eup %3290  ;;  %v1742_v27 = vadd.f32 1.0, %v3289_v25 }
 0x3d1   : > { %v1744_v40 = vmul.f32 %v3291_v26, %v1741_v21  ;;  %vm1749_vm12 = vweird.f32 %v3291_v26 }
 0x3d2   : > { %3292 = vrcp.f32 %v1742_v27  ;;  %vm1750_vm14 = vmor %vm1748_vm13, %vm1749_vm12  ;;  %v1769_v14 = vand.u32 2147483648, %v1742_v27  ;;  %v1767_v44 = vand.u32 2147483647, %v1742_v27  ;;  %vm1763_vm2 = vweird.f32 %v1742_v27 }
 0x3d3   : > { %v1745_v31 = vsub.f32 1.0, %v1744_v40 }
 0x3d4   : > { %v1770_v49 = vor.u32 1.1754944e-38, %v1769_v14  ;;  %vm1768_vm4 = vcmp.eq.f32.partialorder %v1767_v44, 8.507059e+37 }
 0x3d5   : > { %v1746_v1 = vmul.f32 %v3291_v26, %v1745_v31 }
 0x3d7   : > { %v1747_v9 = vadd.f32 %v3291_v26, %v1746_v1 }
 0x3d8   : > { %v3293_v10 = vpop.eup %3292 }
 0x3d9   : > { %v1759_v34 = vmul.f32 %v3293_v10, %v1742_v27  ;;  %v1751_v43 = vsel %vm1750_vm14, %v3291_v26, %v1747_v9  ;;  %vm1764_vm15 = vweird.f32 %v3293_v10  ;;  %v3207_v9 = vld [vmem:[#allocation2 + $0x24] sm:$0xf0] }
 0x3da   : > { %v1756_v47 = vsel %vm1753_vm1, %v1755_v48, %v1751_v43  ;;  %vm1765_vm3 = vmor %vm1763_vm2, %vm1764_vm15 }
 0x3db   : > { %v1760_v17 = vsub.f32 1.0, %v1759_v34  ;;  %v1773_v58 = vmul.f32 %v1756_v47, %v3842_v32  ;;  %v1808_v32 = vld [vmem:[%s851_s28] sm:$0x7] }
 0x3dc   : > { %v1811_v11 = vperm.slane %v1808_v32, 1  ;;  %v1812_v37 = vperm.slane %v1808_v32, 2 }
 0x3dd   : > { %v1761_v18 = vmul.f32 %v3293_v10, %v1760_v17 }
 0x3df   : > { %v1762_v46 = vadd.f32 %v3293_v10, %v1761_v18 }
 0x3e1   : > { %v1766_v53 = vsel %vm1765_vm3, %v3293_v10, %v1762_v46  ;;  %v3071_v10 = vld [vmem:[#allocation2 + $0x10] sm:$0xf] }
 0x3e2   : > { %v1771_v57 = vsel %vm1768_vm4, %v1770_v49, %v1766_v53  ;;  %v3072_v49 = vor.u32 %v3207_v9, %v3071_v10  ;;  %v3076_v53 = vor.u32 %v3204_v35, %v3073_v36 }
 0x3e3   : > { %v1774_v59 = vmul.f32 %v1771_v57, %v1733_v13  ;;  %v1810_v13 = vperm.slane %v1808_v32, 0  ;;  %v2277_v57 = vpop.permute.xlu1 %2276 }
 0x3e5   : > { %v1775_v60 = vpack.c.bf16 %v1774_v59, %v1773_v58  ;;  %v2282_v58 = vpop.permute.xlu0 %2281 }
 0x3e7   : > { %1952 = vmatmul.bf16.vlgmr.msra.gmra.mxu3 %v1775_v60  ;;  %1966 = vmatmul.bf16.vlgmr.msrb.gmra.mxu0 %v1775_v60 }
 0x3e8   : > { %1980 = vmatmul.bf16.vlgmr.msrb.gmra.mxu2 %v1775_v60 }
 0x3eb   : > { %v2267_v59 = vpop.permute.xlu1 %2266 }
 0x3f8   : > { %3083 = vmatmul.msk.bf16.vlgmr.msra.gmra.mxu2 %vm1310_vm0, %v3522_v5 }
 0x408   : > { %3084 = vmatmul.msk.bf16.gmra.mxu2 %vm1310_vm0, %v3532_v12 }
 0x464   : > { %v1967_v7 = vpop.f32.mrf.mxu0 }
 0x465   : > { %v1968_v20 = vadd.f32 %v1967_v7, %v1811_v11 }
 0x46a   : > { %v1953_v45 = vpop.f32.mrf.mxu3 }
 0x46b   : > { %v1954_v50 = vadd.f32 %v1953_v45, %v1810_v13  ;;  %v1981_v8 = vpop.f32.mrf.mxu2  ;;  %v2272_v45 = vpop.permute.xlu0 %2271 }
 0x46c   : > { %v1982_v21 = vadd.f32 %v1981_v8, %v1812_v37  ;;  %v1969_v26 = vpop.f32.mrf.mxu0 }
 0x46d   : > { %v1986_v24 = vpack.c.bf16 %v1968_v20, %v1954_v50  ;;  %v1970_v40 = vadd.f32 %v1969_v26, %v1811_v11 }
 0x46e   : > { %v1987_v25 = vpack.c.bf16 %v1982_v21, %v1982_v21 }
 0x46f   : > { %1990 = vst [vmem:[#allocation2] sm:$0xff] %v1986_v24 }
 0x470   : > { %1991 = vst [vmem:[#allocation2 + $0x8] sm:$0xf] %v1987_v25 }
 0x472   : > { %v1955_v27 = vpop.f32.mrf.mxu3 }
 0x473   : > { %v1956_v33 = vadd.f32 %v1955_v27, %v1810_v13  ;;  %v1983_v31 = vpop.f32.mrf.mxu2 }
 0x474   : > { %v1984_v6 = vadd.f32 %v1983_v31, %v1812_v37 }
 0x475   : > { %v1988_v1 = vpack.c.bf16 %v1970_v40, %v1956_v33 }
 0x476   : > { %v1989_v2 = vpack.c.bf16 %v1984_v6, %v1984_v6  ;;  %v3055_v34 = vld [vmem:[#allocation2] sm:$0xf]  ;;  %v3202_v14 = vld [vmem:[#allocation2 + $0x4] sm:$0xf] }
 0x477   : > { %1992 = vst [vmem:[#allocation2 + $0x18] sm:$0xff] %v1988_v1  ;;  %v3063_v48 = vld [vmem:[#allocation2 + $0x8] sm:$0xf] }
 0x478   : > { %1993 = vst [vmem:[#allocation2 + $0x20] sm:$0xf] %v1989_v2 }
 0x47b   : > { %v2104_v32 = vpop.f32.mrf.mxu2 }
 0x47e   : > { %v3205_v17 = vld [vmem:[#allocation2 + $0x14] sm:$0xf0]  ;;  %v3057_v43 = vld [vmem:[#allocation2 + $0x18] sm:$0xf0] }
 0x47f   : > { %v3056_v18 = vor.u32 %v3205_v17, %v3055_v34  ;;  %v3060_v44 = vor.u32 %v3202_v14, %v3057_v43  ;;  %v3206_v46 = vld [vmem:[#allocation2 + $0x1c] sm:$0xf0] }
 0x480   : > { %v3064_v47 = vor.u32 %v3206_v46, %v3063_v48 }
 0x481   : > { %2045 = vmatpush.bf16.msrb.mxu1 %v3056_v18  ;;  %2064 = vmatpush.bf16.msrb.mxu3 %v3060_v44 }
 0x482   : > { %2083 = vmatpush.bf16.msra.mxu0 %v3064_v47 }
 0x483   : > { %v2106_v25 = vpop.f32.mrf.mxu2 }
 0x484   : > { %3077 = vmatmul.msk.bf16.vlgmr.msrb.gmra.mxu1 %vm1310_vm0, %v3522_v5  ;;  %3079 = vmatmul.msk.bf16.vlgmr.msrb.gmra.mxu3 %vm1310_vm0, %v3522_v5 }
 0x485   : > { %2121 = vmatpush.bf16.msra.mxu1 %v3072_v49  ;;  %2140 = vmatpush.bf16.msra.mxu3 %v3076_v53 }
 0x486   : > { %3081 = vmatmul.msk.bf16.vlgmr.msra.gmra.mxu0 %vm1310_vm0, %v3522_v5 }
 0x48b   : > { %v2109_v36 = vpop.f32.mrf.mxu2 }
 0x494   : > { %3078 = vmatmul.msk.bf16.gmra.mxu1 %vm1310_vm0, %v3532_v12  ;;  %3080 = vmatmul.msk.bf16.gmra.mxu3 %vm1310_vm0, %v3532_v12 }
 0x496   : > { %3082 = vmatmul.msk.bf16.gmra.mxu0 %vm1310_vm0, %v3532_v12 }
 0x4a4   : > { %3085 = vmatmul.msk.bf16.vlgmr.msra.gmra.mxu1 %vm1310_vm0, %v3522_v5  ;;  %3087 = vmatmul.msk.bf16.vlgmr.msra.gmra.mxu3 %vm1310_vm0, %v3522_v5 }
 0x4b4   : > { %3086 = vmatmul.msk.bf16.gmra.mxu1 %vm1310_vm0, %v3532_v12  ;;  %3088 = vmatmul.msk.bf16.gmra.mxu3 %vm1310_vm0, %v3532_v12 }
 0x501   : > { %v2047_v60 = vpop.f32.mrf.mxu1 }
 0x502   : > { %v2284_v63 = vmul.f32 %v2267_v59, %v2047_v60 }
 0x503   : > { %v2085_v4 = vpop.f32.mrf.mxu0 }
 0x504   : > { %v2296_v7 = vpack.c.bf16 %v2284_v63, %v2284_v63  ;;  %v2286_v11 = vmul.f32 %v2267_v59, %v2085_v4  ;;  %v2111_v63 = vpop.f32.mrf.mxu2 }
 0x506   : > { %2300 = vst [vmem:[#allocation3] sm:$0xf] %v2296_v7  ;;  %v2304_v20 = vmul.f32 %v2286_v11, %v3698_v39  ;;  %v2324_v7 = vmul.f32 %v2286_v11, %v3701_v41 }
 0x507   : > { %v2066_v13 = vpop.f32.mrf.mxu3 }
 0x508   : > { %v2285_v37 = vmul.f32 %v2267_v59, %v2066_v13 }
 0x509   : > { %v2049_v5 = vpop.f32.mrf.mxu1 }
 0x50a   : > { %v2308_v50 = vmul.f32 %v2285_v37, %v2104_v32  ;;  %v2287_v8 = vmul.f32 %v2272_v45, %v2049_v5 }
 0x50b   : > { %v2087_v21 = vpop.f32.mrf.mxu0 }
 0x50c   : > { %v2312_v12 = vadd.f32 %v2308_v50, %v2304_v20  ;;  %v2297_v24 = vpack.c.bf16 %v2287_v8, %v2287_v8  ;;  %v2289_v27 = vmul.f32 %v2272_v45, %v2087_v21  ;;  %v2344_v8 = vmul.f32 %v2286_v11, %v3704_v42 }
 0x50e   : > { %v2316_v26 = vpack.c.bf16 %v2312_v12, %v2312_v12  ;;  %2301 = vst [vmem:[#allocation3 + $0x10] sm:$0xf] %v2297_v24  ;;  %v2305_v6 = vmul.f32 %v2289_v27, %v3710_v54  ;;  %v2325_v24 = vmul.f32 %v2289_v27, %v3713_v55 }
 0x50f   : > { %v2068_v40 = vpop.f32.mrf.mxu3 }
 0x510   : > { %2320 = vst [vmem:[#allocation3 + $0x4] sm:$0xf] %v2316_v26  ;;  %v2288_v33 = vmul.f32 %v2272_v45, %v2068_v40 }
 0x511   : > { %v2052_v31 = vpop.f32.mrf.mxu1 }
 0x512   : > { %v2309_v1 = vmul.f32 %v2288_v33, %v2106_v25  ;;  %v2290_v2 = vmul.f32 %v2277_v57, %v2052_v31 }
 0x513   : > { %v2090_v10 = vpop.f32.mrf.mxu0 }
 0x514   : > { %v2313_v9 = vadd.f32 %v2309_v1, %v2305_v6  ;;  %v2298_v39 = vpack.c.bf16 %v2290_v2, %v2290_v2  ;;  %v3908_v35 = vmul.f32 %v2277_v57, %v2090_v10  ;;  %v2345_v1 = vmul.f32 %v2289_v27, %v3716_v56 }
 0x516   : > { %v2317_v34 = vpack.c.bf16 %v2313_v9, %v2313_v9  ;;  %2302 = vst [vmem:[#allocation3 + $0x20] sm:$0xf] %v2298_v39  ;;  %v2306_v18 = vmul.f32 %v3908_v35, %v3731_v3  ;;  %v2326_v9 = vmul.f32 %v3908_v35, %v3734_v15  ;;  %v2346_v56 = vmul.f32 %v3908_v35, %v3737_v16 }
 0x517   : > { %v2071_v17 = vpop.f32.mrf.mxu3  ;;  %v3208_v39 = vld [vmem:[#allocation3 + $0x4] sm:$0xf] }
 0x518   : > { %2321 = vst [vmem:[#allocation3 + $0x14] sm:$0xf] %v2317_v34  ;;  %v2291_v14 = vmul.f32 %v2277_v57, %v2071_v17 }
 0x519   : > { %v2054_v43 = vpop.f32.mrf.mxu1 }
 0x51a   : > { %v2310_v44 = vmul.f32 %v2291_v14, %v2109_v36  ;;  %v2293_v48 = vmul.f32 %v2282_v58, %v2054_v43 }
 0x51b   : > { %v2092_v54 = vpop.f32.mrf.mxu0 }
 0x51c   : > { %v2314_v46 = vadd.f32 %v2310_v44, %v2306_v18  ;;  %v2299_v47 = vpack.c.bf16 %v2293_v48, %v2293_v48  ;;  %v2295_v53 = vmul.f32 %v2282_v58, %v2092_v54 }
 0x51e   : > { %v2318_v49 = vpack.c.bf16 %v2314_v46, %v2314_v46  ;;  %2303 = vst [vmem:[#allocation3 + $0x30] sm:$0xf] %v2299_v47  ;;  %v2307_v32 = vmul.f32 %v2295_v53, %v3748_v28  ;;  %v2327_v44 = vmul.f32 %v2295_v53, %v3751_v29 }
 0x51f   : > { %v2073_v59 = vpop.f32.mrf.mxu3  ;;  %v3097_v11 = vld [vmem:[#allocation3 + $0x10] sm:$0xf0] }
 0x520   : > { %2322 = vst [vmem:[#allocation3 + $0x24] sm:$0xf] %v2318_v49  ;;  %v2294_v60 = vmul.f32 %v2282_v58, %v2073_v59  ;;  %v3100_v17 = vor.u32 %v3208_v39, %v3097_v11  ;;  %v2347_v59 = vmul.f32 %v2295_v53, %v3754_v30 }
 0x521   : > { %v2123_v4 = vpop.f32.mrf.mxu1 }
 0x522   : > { %v2311_v57 = vmul.f32 %v2294_v60, %v2111_v63  ;;  %v2328_v13 = vmul.f32 %v2285_v37, %v2123_v4 }
 0x524   : > { %v2315_v3 = vadd.f32 %v2311_v57, %v2307_v32  ;;  %v2332_v45 = vadd.f32 %v2328_v13, %v2324_v7 }
 0x526   : > { %v2319_v5 = vpack.c.bf16 %v2315_v3, %v2315_v3  ;;  %v2336_v20 = vpack.c.bf16 %v2332_v45, %v2332_v45 }
 0x527   : > { %v2142_v50 = vpop.f32.mrf.mxu3  ;;  %v3211_v31 = vld [vmem:[#allocation3 + $0x24] sm:$0xf] }
 0x528   : > { %2323 = vst [vmem:[#allocation3 + $0x34] sm:$0xf] %v2319_v5  ;;  %v2348_v21 = vmul.f32 %v2285_v37, %v2142_v50  ;;  %v3237_v50 = vld [vmem:[%s3994_s29] ss:$0 sm:$0xff] }
 0x529   : > { %2340 = vst [vmem:[#allocation3 + $0x8] sm:$0xf] %v2336_v20  ;;  %v2125_v12 = vpop.f32.mrf.mxu1  ;;  %vm2454_vm5 = vcmp.eq.s32.totalorder %v3763_v38, %v3237_v50 }
 0x52a   : > { %v2352_v58 = vadd.f32 %v2348_v21, %v2344_v8  ;;  %v2329_v25 = vmul.f32 %v2288_v33, %v2125_v12 }
 0x52c   : > { %v2356_v28 = vpack.c.bf16 %v2352_v58, %v2352_v58  ;;  %v2333_v26 = vadd.f32 %v2329_v25, %v2325_v24  ;;  %v3124_v58 = vsel %vm2454_vm5, 1.0, %v3303_v61  ;;  %v2503_v61 = vld [vmem:[%s858_s0] sm:$0x7] }
 0x52d   : > { %v2457_v24 = vpack.c.bf16 %v3124_v58, %v3124_v58 }
 0x52e   : > { %2360 = vst [vmem:[#allocation3 + $0xc] sm:$0xf] %v2356_v28  ;;  %v2337_v41 = vpack.c.bf16 %v2333_v26, %v2333_v26 }
 0x52f   : > { %v2144_v40 = vpop.f32.mrf.mxu3  ;;  %v3109_v6 = vld [vmem:[#allocation3 + $0x30] sm:$0xf0] }
 0x530   : > { %2341 = vst [vmem:[#allocation3 + $0x18] sm:$0xf] %v2337_v41  ;;  %v2349_v2 = vmul.f32 %v2288_v33, %v2144_v40  ;;  %v3112_v10 = vor.u32 %v3211_v31, %v3109_v6  ;;  %v3103_v7 = vld [vmem:[#allocation3 + $0x8] sm:$0xf]  ;;  %v2505_v6 = vperm.slane %v2503_v61, 0 }
 0x531   : > { %v2128_v42 = vpop.f32.mrf.mxu1 }
 0x532   : > { %v2353_v37 = vadd.f32 %v2349_v2, %v2345_v1  ;;  %v2330_v55 = vmul.f32 %v2291_v14, %v2128_v42  ;;  %2410 = vmatpush.bf16.msrb.mxu0 %v3112_v10  ;;  %v2507_v2 = vperm.slane %v2503_v61, 2 }
 0x534   : > { %v2357_v34 = vpack.c.bf16 %v2353_v37, %v2353_v37  ;;  %v2334_v36 = vadd.f32 %v2330_v55, %v2326_v9 }
 0x535   : > { %v3209_v30 = vld [vmem:[#allocation3 + $0xc] sm:$0xf] }
 0x536   : > { %2361 = vst [vmem:[#allocation3 + $0x1c] sm:$0xf] %v2357_v34  ;;  %v2338_v43 = vpack.c.bf16 %v2334_v36, %v2334_v36  ;;  %2411 = vmatpush.bf16.msrb.mxu0 %v3100_v17 }
 0x537   : > { %v2147_v18 = vpop.f32.mrf.mxu3  ;;  %v3210_v57 = vld [vmem:[#allocation3 + $0x14] sm:$0xf0] }
 0x538   : > { %2342 = vst [vmem:[#allocation3 + $0x28] sm:$0xf] %v2338_v43  ;;  %v2350_v27 = vmul.f32 %v2291_v14, %v2147_v18  ;;  %v3104_v29 = vor.u32 %v3210_v57, %v3103_v7 }
 0x539   : > { %v2130_v33 = vpop.f32.mrf.mxu1  ;;  %3121 = vmatmul.msk.bf16.vlgmr.msrb.gmra.mxu0 %vm1590_vm11, %v3775_v19 }
 0x53a   : > { %v2354_v15 = vadd.f32 %v2350_v27, %v2346_v56  ;;  %v2331_v48 = vmul.f32 %v2294_v60, %v2130_v33 }
 0x53c   : > { %v2358_v54 = vpack.c.bf16 %v2354_v15, %v2354_v15  ;;  %v2335_v46 = vadd.f32 %v2331_v48, %v2327_v44 }
 0x53d   : > { %v3105_v5 = vld [vmem:[#allocation3 + $0x18] sm:$0xf0] }
 0x53e   : > { %2362 = vst [vmem:[#allocation3 + $0x2c] sm:$0xf] %v2358_v54  ;;  %v2339_v47 = vpack.c.bf16 %v2335_v46, %v2335_v46  ;;  %v3108_v53 = vor.u32 %v3209_v30, %v3105_v5 }
 0x53f   : > { %v2149_v49 = vpop.f32.mrf.mxu3  ;;  %v3115_v35 = vld [vmem:[#allocation3 + $0x28] sm:$0xf] }
 0x540   : > { %2343 = vst [vmem:[#allocation3 + $0x38] sm:$0xf] %v2339_v47  ;;  %v2351_v63 = vmul.f32 %v2294_v60, %v2149_v49 }
 0x542   : > { %v2355_v4 = vadd.f32 %v2351_v63, %v2347_v59 }
 0x544   : > { %v2359_v16 = vpack.c.bf16 %v2355_v4, %v2355_v4 }
 0x545   : > { %v3212_v13 = vld [vmem:[#allocation3 + $0x2c] sm:$0xf] }
 0x546   : > { %2363 = vst [vmem:[#allocation3 + $0x3c] sm:$0xf] %v2359_v16 }
 0x547   : > { %v3213_v14 = vld [vmem:[#allocation3 + $0x34] sm:$0xf0] }
 0x548   : > { %v3116_v32 = vor.u32 %v3213_v14, %v3115_v35 }
 0x54a   : > { %2424 = vmatpush.bf16.msrb.mxu2 %v3116_v32 }
 0x54d   : > { %v3117_v3 = vld [vmem:[#allocation3 + $0x38] sm:$0xf0] }
 0x54e   : > { %2425 = vmatpush.bf16.msrb.mxu2 %v3104_v29  ;;  %v3120_v45 = vor.u32 %v3212_v13, %v3117_v3 }
 0x550   : > { %2438 = vmatpush.bf16.msra.mxu0 %v3120_v45 }
 0x551   : > { %3122 = vmatmul.msk.bf16.vlgmr.msrb.gmra.mxu2 %vm1590_vm11, %v3775_v19 }
 0x554   : > { %2439 = vmatpush.bf16.msra.mxu0 %v3108_v53 }
 0x557   : > { %3123 = vmatmul.msk.bf16.vlgmr.msra.gmra.mxu0 %vm1590_vm11, %v3775_v19 }
 0x5b6   : > { %v2413_v60 = vpop.f32.mrf.mxu0 }
 0x5b7   : > { %v2446_v8 = vadd.f32 %v2413_v60, %v3850_v51 }
 0x5be   : > { %v2415_v20 = vpop.f32.mrf.mxu0 }
 0x5bf   : > { %v2449_v21 = vadd.f32 %v2415_v20, %v3863_v22 }
 0x5c1   : > { %v2458_v12 = vpack.c.bf16 %v2449_v21, %v2446_v8 }
 0x5c3   : > { %2471 = vmatpush.bf16.msrb.mxu1 %v2458_v12 }
 0x5c6   : > { %3125 = vmatmul.msk.bf16.vlgmr.msrb.gmra.mxu1 %vm1310_vm0, %v2457_v24 }
 0x5d4   : > { %v2427_v19 = vpop.f32.mrf.mxu2  ;;  %v2441_v25 = vpop.f32.mrf.mxu0 }
 0x5d5   : > { %v2447_v41 = vadd.f32 %v2427_v19, %v3852_v52  ;;  %v2448_v51 = vadd.f32 %v2441_v25, %v3870_v62 }
 0x5dc   : > { %v2429_v28 = vpop.f32.mrf.mxu2  ;;  %v2443_v26 = vpop.f32.mrf.mxu0 }
 0x5dd   : > { %v2450_v22 = vadd.f32 %v2429_v28, %v3865_v23  ;;  %v2451_v38 = vadd.f32 %v2443_v26, %v3874_v0  ;;  %v2506_v0 = vperm.slane %v2503_v61, 1 }
 0x5df   : > { %v2459_v40 = vpack.c.bf16 %v2450_v22, %v2447_v41  ;;  %v2460_v31 = vpack.c.bf16 %v2451_v38, %v2448_v51 }
 0x5e1   : > { %2484 = vmatpush.bf16.msra.mxu2 %v2459_v40  ;;  %2497 = vmatpush.bf16.msrb.mxu3 %v2460_v31 }
 0x5e4   : > { %3126 = vmatmul.msk.bf16.vlgmr.msra.gmra.mxu2 %vm1310_vm0, %v2457_v24  ;;  %3127 = vmatmul.msk.bf16.vlgmr.msrb.gmra.mxu3 %vm1310_vm0, %v2457_v24  ;;  %vm2524_vm0 = vcmask 7168  }
 0x643   : > { %v2473_v52 = vpop.f32.mrf.mxu1 }
 0x644   : > { %v2511_v62 = vmul.f32 %v2505_v6, %v2473_v52 }
 0x646   : > { %v2515_v23 = vsel %vm2514_vm6, %v2511_v62, 0.0 }
 0x647   : > { %2516 = vadd.xlane.f32.xlu1 %v2515_v23 }
 0x64b   : > { %v2475_v1 = vpop.f32.mrf.mxu1 }
 0x667   : > { %v2486_v10 = vpop.f32.mrf.mxu2  ;;  %v2499_v42 = vpop.f32.mrf.mxu3 }
 0x668   : > { %v2512_v11 = vmul.f32 %v2506_v0, %v2486_v10  ;;  %v2513_v37 = vmul.f32 %v2507_v2, %v2499_v42 }
 0x66a   : > { %v2518_v9 = vsel %vm2514_vm6, %v2512_v11, 0.0  ;;  %v2521_v55 = vsel %vm2514_vm6, %v2513_v37, 0.0 }
 0x66b   : > { %2519 = vadd.xlane.f32.xlu0 %v2518_v9  ;;  %2522 = vadd.xlane.f32.xlu2 %v2521_v55 }
 0x66f   : > { %v2488_v39 = vpop.f32.mrf.mxu2  ;;  %v2501_v34 = vpop.f32.mrf.mxu3 }
 0x6ba   : > { %v2517_v36 = vpop.xlane.xlu1 %2516 }
 0x6de   : > { %v2520_v17 = vpop.xlane.xlu0 %2519  ;;  %v2523_v43 = vpop.xlane.xlu2 %2522 }
 0x6df   : > { %v2525_v18 = vsel %vm2524_vm0, %v2517_v36, %v2520_v17 }
 0x6e0   : > { %v2527_v56 = vsel %vm2526_vm7, %v2525_v18, %v2523_v43 }
 0x6e1   : > { %2529 = vst.msk [vmem:[%s862_s25] sm:$0x3] %vm2528_vm8, %v2527_v56 }
 0x6e2 PF: > { %s30_s1 = sadd.s32 1, %s3300_s1  }
 0x6e3   : > { %p27_p4 = scmp.ge.s32.totalorder %s30_s1, 4  }
 0x6e5   :  { %29 = sbr.rel (!%p27_p4) target bundleno = 6 (0x6), region = 172 }

</bundles_post_ra>
